<compile_context>
chip_gen: v7x
topology: tpu7x:2x2x1
jax: 0.10.0
libtpu: 0.0.40
codegen_flags: <defaults>
</compile_context>

<pallas_src>
import math
import functools

import jax
import jax.numpy as jnp
from jax.experimental import pallas as pl
from jax.experimental.pallas import tpu as pltpu


# ----------------------------------------------------------------------------
# Fused decoder-layer kernel: one batch element per grid step.
# All activation tensors inside are (rows, channels) with channels on lanes.
# ----------------------------------------------------------------------------
def _decoder_layer_kernel(
        tgt_ref, qpos_ref, mem_ref, pos_ref,
        masks_ref,
        sa_wqk_ref, sa_bqk_ref, sa_wv_ref, sa_bv_ref, sa_woh_ref, sa_bo_ref,
        ca_wq_ref, ca_bq_ref, ca_wk_ref, ca_bk_ref, ca_wv_ref, ca_bv_ref,
        ca_woh_ref, ca_bo_ref,
        ln_ref,
        dw1_ref, pw1_ref, pb1_ref, dw2_ref, pw2_ref, pb2_ref,
        out_ref, *, nhead, conv_w):
    f32 = jnp.float32
    tgt = tgt_ref[...]       # (S, E)
    qpos = qpos_ref[...]     # (S, E)
    mem = mem_ref[...]       # (M, E)
    pos = pos_ref[...]       # (M, E)
    S, E = tgt.shape
    hd = E // nhead
    scale = 1.0 / math.sqrt(hd)

    def split_heads(x):
        # (L, E) -> (nhead, L, hd).  Concat-of-slices is kept (vs. reshape+transpose)
        # because it is the lowering-safe way to get a head-major batch axis.
        L = x.shape[0]
        return jnp.concatenate(
            [x[:, h * hd:(h + 1) * hd].reshape(1, L, hd) for h in range(nhead)],
            axis=0)

    def attend(q, k, v, woh_ref, bo_ref):
        qh = split_heads(q.astype(f32) * scale)                  # (h, Lq, hd)
        kh = split_heads(k)                                      # (h, Lk, hd)
        vh = split_heads(v)
        logits = jnp.einsum('hqd,hkd->hqk', qh, kh, preferred_element_type=f32)
        logits = logits - jnp.max(logits, axis=-1, keepdims=True)
        p = jnp.exp(logits)
        p = p * pl.reciprocal(jnp.sum(p, axis=-1, keepdims=True), approx=True)
        o = jnp.einsum('hqk,hkd->hqd', p.astype(vh.dtype), vh,
                       preferred_element_type=f32)               # (h, Lq, hd)
        # Per-head fold of the output projection (no lane-concat head merge).
        proj = jnp.einsum('hqd,hde->hqe', o, woh_ref[...],
                          preferred_element_type=f32)            # (h, Lq, E)
        out = proj[0]
        for hh in range(1, nhead):
            out = out + proj[hh]
        return out + bo_ref[...].astype(f32)

    def add_ln(x, res, g, b):
        y = (x + res).astype(f32)
        mu = jnp.mean(y, axis=-1, keepdims=True)
        var = jnp.mean(y * y, axis=-1, keepdims=True) - mu * mu  # one-pass stats
        return (y - mu) * jax.lax.rsqrt(var + 1e-5) * g.astype(f32) + b.astype(f32)

    ln = ln_ref[...]                                             # (6, E)

    # ---- self attention (q_in == k_in == tgt + query_pos; fused QK matmul) ----
    x = tgt + qpos
    qk = (jnp.dot(x, sa_wqk_ref[...], preferred_element_type=f32)
          + sa_bqk_ref[...].astype(f32))                         # (S, 2E)
    v_sa = (jnp.dot(tgt, sa_wv_ref[...], preferred_element_type=f32)
            + sa_bv_ref[...].astype(f32))
    sa = attend(qk[:, :E], qk[:, E:], v_sa, sa_woh_ref, sa_bo_ref)
    x1 = add_ln(tgt, sa, ln[0:1], ln[3:4])

    # ---- cross attention over memory ----
    q_ca = (jnp.dot(x1 + qpos, ca_wq_ref[...], preferred_element_type=f32)
            + ca_bq_ref[...].astype(f32))
    k_ca = (jnp.dot(mem + pos, ca_wk_ref[...], preferred_element_type=f32)
            + ca_bk_ref[...].astype(f32))
    v_ca = (jnp.dot(mem, ca_wv_ref[...], preferred_element_type=f32)
            + ca_bv_ref[...].astype(f32))
    ca = attend(q_ca, k_ca, v_ca, ca_woh_ref, ca_bo_ref)
    x2 = add_ln(x1, ca, ln[1:2], ln[4:5])

    # ---- depthwise-separable conv FFN, token-major (S, C) layout ----
    # token row s = i*W + j of the (H, W) image.  The 3x3 taps are sublane
    # rotations (pltpu.roll) of the slab; column boundaries are pre-masked once
    # on the source, row boundaries masked once per row group.
    masks = masks_ref[...].astype(f32)       # (S, 4)
    ml = masks[:, 0:1]   # source valid for the +1 column tap  (j != 0)
    mr = masks[:, 1:2]   # source valid for the -1 column tap  (j != W-1)
    mt = masks[:, 2:3]   # output valid for the -1 row tap     (i != 0)
    mb = masks[:, 3:4]   # output valid for the +1 row tap     (i != H-1)
    W = conv_w

    def ds_conv(xin, dw_ref, pw_ref, pb_ref, relu):
        dw = dw_ref[...].astype(f32)                             # (9, C), BN folded
        xl = xin * ml
        xr = xin * mr
        c_m1 = pltpu.roll(xr, shift=1, axis=0)                   # x[s-1], masked
        c_p1 = pltpu.roll(xl, shift=S - 1, axis=0)               # x[s+1], masked

        def row_group(dy):
            return (dw[3 * dy + 0:3 * dy + 1] * c_m1
                    + dw[3 * dy + 1:3 * dy + 2] * xin
                    + dw[3 * dy + 2:3 * dy + 3] * c_p1)

        acc = row_group(1)                                       # centre row init
        acc = acc + pltpu.roll(row_group(0), shift=W, axis=0) * mt
        acc = acc + pltpu.roll(row_group(2), shift=S - W, axis=0) * mb
        y = (jnp.dot(acc, pw_ref[...], preferred_element_type=f32)
             + pb_ref[...].astype(f32))                          # pointwise 1x1
        if relu:
            y = jnp.maximum(y, 0.0)
        return y

    y = ds_conv(x2, dw1_ref, pw1_ref, pb1_ref, relu=True)        # (S, dim_ff)
    y = ds_conv(y, dw2_ref, pw2_ref, pb2_ref, relu=False)        # (S, E)
    x3 = add_ln(x2, y, ln[2:3], ln[5:6])
    out_ref[...] = x3.astype(out_ref.dtype)


# ----------------------------------------------------------------------------
# JAX-side wrapper: layout canonicalization + trace-time weight preparation,
# then one pallas_call over a parallel batch grid.
# ----------------------------------------------------------------------------
def transformer_decoder_layer(tgt, memory, params, nhead, pos=None,
                              query_pos=None, param_dtype=None):
    """forward_post of TransformerDecoderLayer (eval mode, no masks).

    tgt: (S, B, d_model);  memory: (B, d_model, Hm, Wm) NCHW.
    """
    S, B, E = tgt.shape
    _, _, Hm, Wm = memory.shape
    M = Hm * Wm
    w = h = int(math.sqrt(S))            # to_2tuple(int(sqrt(S)))
    assert w * h == S, "sequence length must be a perfect square for the conv FFN"
    assert E % nhead == 0
    hd = E // nhead
    wd = param_dtype if param_dtype is not None else tgt.dtype
    f32 = jnp.float32

    if query_pos is None:
        query_pos = jnp.zeros_like(tgt)
    if pos is None:
        pos = jnp.zeros((M, B, E), tgt.dtype)

    # Input layout canonicalization only (intermediates never leave VMEM).
    tgt_b = jnp.transpose(tgt, (1, 0, 2))                        # (B, S, E)
    qpos_b = jnp.transpose(query_pos, (1, 0, 2))                 # (B, S, E)
    mem_b = jnp.transpose(memory.reshape(B, E, M), (0, 2, 1))    # (B, M, E)
    pos_b = jnp.transpose(pos, (1, 0, 2))                        # (B, M, E)

    # Conv image-boundary masks over the flattened token index s = i*W + j,
    # conv spatial dims (H, W) = (w, h).
    idx = jnp.arange(S, dtype=jnp.int32)
    jj = idx % h
    ii = idx // h
    masks = jnp.stack([(jj != 0), (jj != h - 1), (ii != 0), (ii != w - 1)],
                      axis=1).astype(f32)                        # (S, 4)

    # ---- trace-time weight preparation ----
    def attn_prep(p):
        wi = jnp.transpose(p['in_w']).astype(wd)                 # (E, 3E), (in,out)
        bi = p['in_b'].reshape(1, 3 * E).astype(f32)
        wo_h = jnp.transpose(p['out_w']).reshape(nhead, hd, E).astype(wd)
        bo = p['out_b'].reshape(1, E).astype(f32)
        return wi, bi, wo_h, bo

    sa_wi, sa_bi, sa_woh, sa_bo = attn_prep(params['self_attn'])
    ca_wi, ca_bi, ca_woh, ca_bo = attn_prep(params['cross_attn'])
    sa_wqk, sa_bqk = sa_wi[:, :2 * E], sa_bi[:, :2 * E]          # fused Q/K
    sa_wv, sa_bv = sa_wi[:, 2 * E:], sa_bi[:, 2 * E:]
    ca_wq, ca_bq = ca_wi[:, :E], ca_bi[:, :E]
    ca_wk, ca_bk = ca_wi[:, E:2 * E], ca_bi[:, E:2 * E]
    ca_wv, ca_bv = ca_wi[:, 2 * E:], ca_bi[:, 2 * E:]

    ln_gb = jnp.concatenate(
        [params['norm1']['gamma'].reshape(1, E),
         params['norm2']['gamma'].reshape(1, E),
         params['norm3']['gamma'].reshape(1, E),
         params['norm1']['beta'].reshape(1, E),
         params['norm2']['beta'].reshape(1, E),
         params['norm3']['beta'].reshape(1, E)], axis=0).astype(f32)

    def conv_prep(p):
        cin = p['dw_w'].shape[-1]
        cout = p['pw_w'].shape[-1]
        bn_scale = p['bn_gamma'] / jnp.sqrt(p['bn_var'] + 1e-5)  # eval-mode BN fold
        dw_f = (p['dw_w'].reshape(9, cin) * bn_scale.reshape(1, cin)).astype(wd)
        bias_f = p['dw_b'] * bn_scale + p['bn_beta'] - p['bn_mean'] * bn_scale
        pb_f = (bias_f @ p['pw_w'] + p['pw_b']).reshape(1, cout).astype(f32)
        return dw_f, p['pw_w'].astype(wd), pb_f

    dw1, pw1, pb1 = conv_prep(params['linear1'])
    dw2, pw2, pb2 = conv_prep(params['linear2'])
    Fdim = params['linear1']['pw_w'].shape[-1]

    weights = (masks,
               sa_wqk, sa_bqk, sa_wv, sa_bv, sa_woh, sa_bo,
               ca_wq, ca_bq, ca_wk, ca_bk, ca_wv, ca_bv, ca_woh, ca_bo,
               ln_gb, dw1, pw1, pb1, dw2, pw2, pb2)

    def _full(a):
        return pl.BlockSpec(a.shape, lambda b, _n=a.ndim: (0,) * _n)

    def _batch(L):
        return pl.BlockSpec((None, L, E), lambda b: (b, 0, 0))

    in_specs = ([_batch(S), _batch(S), _batch(M), _batch(M)]
                + [_full(a) for a in weights])

    # Advisory cost estimate so XLA schedules the wrapper transposes around the call.
    flops = int(B * (2 * S * E * 2 * E + 2 * S * E * E            # self qk + v proj
                     + 4 * S * S * E + 2 * S * E * E              # self attn + out proj
                     + 2 * S * E * E + 4 * M * E * E              # cross q + k/v proj
                     + 4 * S * M * E + 2 * S * E * E              # cross attn + out proj
                     + 18 * S * E + 2 * S * E * Fdim              # conv 1
                     + 18 * S * Fdim + 2 * S * Fdim * E))         # conv 2
    transc = int(B * nhead * S * (S + M))
    nbytes = lambda a: int(a.size) * a.dtype.itemsize
    bytes_acc = int(sum(nbytes(a) for a in (tgt_b, qpos_b, mem_b, pos_b) + weights)
                    + nbytes(tgt_b))

    out_b = pl.pallas_call(
        functools.partial(_decoder_layer_kernel, nhead=nhead, conv_w=h),
        out_shape=jax.ShapeDtypeStruct((B, S, E), tgt.dtype),
        grid=(B,),
        in_specs=in_specs,
        out_specs=pl.BlockSpec((None, S, E), lambda b: (b, 0, 0)),
        compiler_params=pltpu.CompilerParams(
            dimension_semantics=("parallel",),        # both v7x TensorCores get a batch
            vmem_limit_bytes=48 * 1024 * 1024),       # < 64 MiB physical on v7x
        cost_estimate=pl.CostEstimate(flops=flops, transcendentals=transc,
                                      bytes_accessed=bytes_acc),
    )(tgt_b, qpos_b, mem_b, pos_b, *weights)

    return jnp.transpose(out_b, (1, 0, 2))            # back to (S, B, E)


# ----------------------------------------------------------------------------
# Deterministic parameter initialization (synthetic; shapes from __init__)
# ----------------------------------------------------------------------------
def init_params(key, d_model, dim_ff):
    ks = jax.random.split(key, 12)

    def rnd(k, shape, scale=0.1):
        return scale * jax.random.normal(k, shape, jnp.float32)

    def attn_params(kw, ko):
        return dict(in_w=rnd(kw, (3 * d_model, d_model)),        # PyTorch (out,in)
                    in_b=jnp.zeros((3 * d_model,), jnp.float32),
                    out_w=rnd(ko, (d_model, d_model)),
                    out_b=jnp.zeros((d_model,), jnp.float32))

    def dsconv_params(kdw, kdb, kpw, kpb, cin, cout):
        return dict(dw_w=rnd(kdw, (3, 3, cin)),                  # depthwise (3,3,Cin)
                    dw_b=rnd(kdb, (cin,)),
                    bn_gamma=jnp.ones((cin,), jnp.float32),
                    bn_beta=jnp.zeros((cin,), jnp.float32),
                    bn_mean=jnp.zeros((cin,), jnp.float32),
                    bn_var=jnp.ones((cin,), jnp.float32),
                    pw_w=rnd(kpw, (cin, cout)),                  # pointwise (Cin,Cout)
                    pw_b=rnd(kpb, (cout,)))

    ln = lambda n: dict(gamma=jnp.ones((n,), jnp.float32),
                        beta=jnp.zeros((n,), jnp.float32))

    return {
        'self_attn': attn_params(ks[0], ks[1]),
        'cross_attn': attn_params(ks[2], ks[3]),
        'linear1': dsconv_params(ks[4], ks[5], ks[6], ks[7], d_model, dim_ff),
        'linear2': dsconv_params(ks[8], ks[9], ks[10], ks[11], dim_ff, d_model),
        'norm1': ln(d_model), 'norm2': ln(d_model), 'norm3': ln(d_model),
    }


# ----------------------------------------------------------------------------
if __name__ == "__main__":
    d_model, nhead, dim_ff = 32, 4, 64
    S, B = 16, 2            # S must be a perfect square (w = h = 4)
    Hm = Wm = 4             # memory spatial dims

    root = jax.random.PRNGKey(0)
    k_p, k_tgt, k_mem, k_qpos, k_pos = jax.random.split(root, 5)

    params = init_params(k_p, d_model, dim_ff)
    tgt = jax.random.normal(k_tgt, (S, B, d_model), jnp.float32)
    memory = jax.random.normal(k_mem, (B, d_model, Hm, Wm), jnp.float32)
    query_pos = jax.random.normal(k_qpos, (S, B, d_model), jnp.float32)
    pos = jax.random.normal(k_pos, (Hm * Wm, B, d_model), jnp.float32)

    layer = jax.jit(lambda t, m, p_, qp_: transformer_decoder_layer(
        t, m, params, nhead, pos=p_, query_pos=qp_))
    out = layer(tgt, memory, pos, query_pos)
    out = jax.block_until_ready(out)
    assert out.shape == (S, B, d_model) and bool(jnp.all(jnp.isfinite(out)))
    print("KERNEL_OK")
</pallas_src>

<mosaic_0001>
module attributes {stable_mosaic.version = 11 : i64} {
  func.func @_decoder_layer_kernel(%arg0: i32, %arg1: memref<1x16x32xf32, #tpu.memory_space<vmem>>, %arg2: memref<1x16x32xf32, #tpu.memory_space<vmem>>, %arg3: memref<1x16x32xf32, #tpu.memory_space<vmem>>, %arg4: memref<1x16x32xf32, #tpu.memory_space<vmem>>, %arg5: memref<16x4xf32, #tpu.memory_space<vmem>>, %arg6: memref<32x64xf32, #tpu.memory_space<vmem>>, %arg7: memref<1x64xf32, #tpu.memory_space<vmem>>, %arg8: memref<32x32xf32, #tpu.memory_space<vmem>>, %arg9: memref<1x32xf32, #tpu.memory_space<vmem>>, %arg10: memref<4x8x32xf32, #tpu.memory_space<vmem>>, %arg11: memref<1x32xf32, #tpu.memory_space<vmem>>, %arg12: memref<32x32xf32, #tpu.memory_space<vmem>>, %arg13: memref<1x32xf32, #tpu.memory_space<vmem>>, %arg14: memref<32x32xf32, #tpu.memory_space<vmem>>, %arg15: memref<1x32xf32, #tpu.memory_space<vmem>>, %arg16: memref<32x32xf32, #tpu.memory_space<vmem>>, %arg17: memref<1x32xf32, #tpu.memory_space<vmem>>, %arg18: memref<4x8x32xf32, #tpu.memory_space<vmem>>, %arg19: memref<1x32xf32, #tpu.memory_space<vmem>>, %arg20: memref<6x32xf32, #tpu.memory_space<vmem>>, %arg21: memref<9x32xf32, #tpu.memory_space<vmem>>, %arg22: memref<32x64xf32, #tpu.memory_space<vmem>>, %arg23: memref<1x64xf32, #tpu.memory_space<vmem>>, %arg24: memref<9x64xf32, #tpu.memory_space<vmem>>, %arg25: memref<64x32xf32, #tpu.memory_space<vmem>>, %arg26: memref<1x32xf32, #tpu.memory_space<vmem>>, %arg27: memref<1x16x32xf32, #tpu.memory_space<vmem>>) attributes {dimension_semantics = [#tpu.dimension_semantics<parallel>], iteration_bounds = array<i64: 2>, scalar_prefetch = 0 : i64, scratch_operands = 0 : i64, tpu.core_type = #tpu.core_type<tc>, window_params = [{transform_indices = @transform_0, window_bounds = array<i64: 1, 16, 32>}, {transform_indices = @transform_1, window_bounds = array<i64: 1, 16, 32>}, {transform_indices = @transform_2, window_bounds = array<i64: 1, 16, 32>}, {transform_indices = @transform_3, window_bounds = array<i64: 1, 16, 32>}, {pipeline_mode = #tpu.pipeline_mode<synchronous>, transform_indices = @transform_4, window_bounds = array<i64: 16, 4>}, {pipeline_mode = #tpu.pipeline_mode<synchronous>, transform_indices = @transform_5, window_bounds = array<i64: 32, 64>}, {pipeline_mode = #tpu.pipeline_mode<synchronous>, transform_indices = @transform_6, window_bounds = array<i64: 1, 64>}, {pipeline_mode = #tpu.pipeline_mode<synchronous>, transform_indices = @transform_7, window_bounds = array<i64: 32, 32>}, {pipeline_mode = #tpu.pipeline_mode<synchronous>, transform_indices = @transform_8, window_bounds = array<i64: 1, 32>}, {pipeline_mode = #tpu.pipeline_mode<synchronous>, transform_indices = @transform_9, window_bounds = array<i64: 4, 8, 32>}, {pipeline_mode = #tpu.pipeline_mode<synchronous>, transform_indices = @transform_10, window_bounds = array<i64: 1, 32>}, {pipeline_mode = #tpu.pipeline_mode<synchronous>, transform_indices = @transform_11, window_bounds = array<i64: 32, 32>}, {pipeline_mode = #tpu.pipeline_mode<synchronous>, transform_indices = @transform_12, window_bounds = array<i64: 1, 32>}, {pipeline_mode = #tpu.pipeline_mode<synchronous>, transform_indices = @transform_13, window_bounds = array<i64: 32, 32>}, {pipeline_mode = #tpu.pipeline_mode<synchronous>, transform_indices = @transform_14, window_bounds = array<i64: 1, 32>}, {pipeline_mode = #tpu.pipeline_mode<synchronous>, transform_indices = @transform_15, window_bounds = array<i64: 32, 32>}, {pipeline_mode = #tpu.pipeline_mode<synchronous>, transform_indices = @transform_16, window_bounds = array<i64: 1, 32>}, {pipeline_mode = #tpu.pipeline_mode<synchronous>, transform_indices = @transform_17, window_bounds = array<i64: 4, 8, 32>}, {pipeline_mode = #tpu.pipeline_mode<synchronous>, transform_indices = @transform_18, window_bounds = array<i64: 1, 32>}, {pipeline_mode = #tpu.pipeline_mode<synchronous>, transform_indices = @transform_19, window_bounds = array<i64: 6, 32>}, {pipeline_mode = #tpu.pipeline_mode<synchronous>, transform_indices = @transform_20, window_bounds = array<i64: 9, 32>}, {pipeline_mode = #tpu.pipeline_mode<synchronous>, transform_indices = @transform_21, window_bounds = array<i64: 32, 64>}, {pipeline_mode = #tpu.pipeline_mode<synchronous>, transform_indices = @transform_22, window_bounds = array<i64: 1, 64>}, {pipeline_mode = #tpu.pipeline_mode<synchronous>, transform_indices = @transform_23, window_bounds = array<i64: 9, 64>}, {pipeline_mode = #tpu.pipeline_mode<synchronous>, transform_indices = @transform_24, window_bounds = array<i64: 64, 32>}, {pipeline_mode = #tpu.pipeline_mode<synchronous>, transform_indices = @transform_25, window_bounds = array<i64: 1, 32>}, {transform_indices = @transform_26, window_bounds = array<i64: 1, 16, 32>}]} {
    %c0 = arith.constant 0 : index
    %c0_0 = arith.constant 0 : index
    %c0_1 = arith.constant 0 : index
    %0 = vector.load %arg1[%c0, %c0_0, %c0_1] : memref<1x16x32xf32, #tpu.memory_space<vmem>>, vector<1x16x32xf32>
    %1 = vector.shape_cast %0 : vector<1x16x32xf32> to vector<16x32xf32>
    %c0_2 = arith.constant 0 : index
    %c0_3 = arith.constant 0 : index
    %c0_4 = arith.constant 0 : index
    %2 = vector.load %arg2[%c0_2, %c0_3, %c0_4] : memref<1x16x32xf32, #tpu.memory_space<vmem>>, vector<1x16x32xf32>
    %3 = vector.shape_cast %2 : vector<1x16x32xf32> to vector<16x32xf32>
    %c0_5 = arith.constant 0 : index
    %c0_6 = arith.constant 0 : index
    %c0_7 = arith.constant 0 : index
    %4 = vector.load %arg3[%c0_5, %c0_6, %c0_7] : memref<1x16x32xf32, #tpu.memory_space<vmem>>, vector<1x16x32xf32>
    %5 = vector.shape_cast %4 : vector<1x16x32xf32> to vector<16x32xf32>
    %c0_8 = arith.constant 0 : index
    %c0_9 = arith.constant 0 : index
    %c0_10 = arith.constant 0 : index
    %6 = vector.load %arg4[%c0_8, %c0_9, %c0_10] : memref<1x16x32xf32, #tpu.memory_space<vmem>>, vector<1x16x32xf32>
    %7 = vector.shape_cast %6 : vector<1x16x32xf32> to vector<16x32xf32>
    %c0_11 = arith.constant 0 : index
    %c0_12 = arith.constant 0 : index
    %8 = vector.load %arg20[%c0_11, %c0_12] : memref<6x32xf32, #tpu.memory_space<vmem>>, vector<6x32xf32>
    %9 = arith.addf %1, %3 : vector<16x32xf32>
    %c0_13 = arith.constant 0 : index
    %c0_14 = arith.constant 0 : index
    %10 = vector.load %arg6[%c0_13, %c0_14] : memref<32x64xf32, #tpu.memory_space<vmem>>, vector<32x64xf32>
    %cst = arith.constant dense<0.000000e+00> : vector<16x64xf32>
    %11 = tpu.matmul %9, %10, %cst {dimension_numbers = #tpu.dot_dimension_numbers<[1], [0], [0], [1], [0, 0, 1, 1], [], []>} : vector<16x32xf32>, vector<32x64xf32>, vector<16x64xf32> -> vector<16x64xf32>
    %c0_15 = arith.constant 0 : index
    %c0_16 = arith.constant 0 : index
    %12 = vector.load %arg7[%c0_15, %c0_16] : memref<1x64xf32, #tpu.memory_space<vmem>>, vector<1x64xf32>
    %13 = vector.broadcast %12 : vector<1x64xf32> to vector<16x64xf32>
    %14 = arith.addf %11, %13 : vector<16x64xf32>
    %c0_17 = arith.constant 0 : index
    %c0_18 = arith.constant 0 : index
    %15 = vector.load %arg8[%c0_17, %c0_18] : memref<32x32xf32, #tpu.memory_space<vmem>>, vector<32x32xf32>
    %cst_19 = arith.constant dense<0.000000e+00> : vector<16x32xf32>
    %16 = tpu.matmul %1, %15, %cst_19 {dimension_numbers = #tpu.dot_dimension_numbers<[1], [0], [0], [1], [0, 0, 1, 1], [], []>} : vector<16x32xf32>, vector<32x32xf32>, vector<16x32xf32> -> vector<16x32xf32>
    %c0_20 = arith.constant 0 : index
    %c0_21 = arith.constant 0 : index
    %17 = vector.load %arg9[%c0_20, %c0_21] : memref<1x32xf32, #tpu.memory_space<vmem>>, vector<1x32xf32>
    %18 = vector.broadcast %17 : vector<1x32xf32> to vector<16x32xf32>
    %19 = arith.addf %16, %18 : vector<16x32xf32>
    %20 = vector.extract_strided_slice %14 {offsets = [0, 0], sizes = [16, 32], strides = [1, 1]} : vector<16x64xf32> to vector<16x32xf32>
    %21 = vector.extract_strided_slice %14 {offsets = [0, 32], sizes = [16, 32], strides = [1, 1]} : vector<16x64xf32> to vector<16x32xf32>
    %cst_22 = arith.constant 0.353553385 : f32
    %22 = vector.broadcast %cst_22 : f32 to vector<16x32xf32>
    %23 = arith.mulf %20, %22 : vector<16x32xf32>
    %24 = vector.extract_strided_slice %23 {offsets = [0, 0], sizes = [16, 8], strides = [1, 1]} : vector<16x32xf32> to vector<16x8xf32>
    %25 = vector.shape_cast %24 : vector<16x8xf32> to vector<1x16x8xf32>
    %26 = vector.extract_strided_slice %23 {offsets = [0, 8], sizes = [16, 8], strides = [1, 1]} : vector<16x32xf32> to vector<16x8xf32>
    %27 = vector.shape_cast %26 : vector<16x8xf32> to vector<1x16x8xf32>
    %28 = vector.extract_strided_slice %23 {offsets = [0, 16], sizes = [16, 8], strides = [1, 1]} : vector<16x32xf32> to vector<16x8xf32>
    %29 = vector.shape_cast %28 : vector<16x8xf32> to vector<1x16x8xf32>
    %30 = vector.extract_strided_slice %23 {offsets = [0, 24], sizes = [16, 8], strides = [1, 1]} : vector<16x32xf32> to vector<16x8xf32>
    %31 = vector.shape_cast %30 : vector<16x8xf32> to vector<1x16x8xf32>
    %32 = tpu.concatenate %25, %27, %29, %31 in 0 : vector<1x16x8xf32>, vector<1x16x8xf32>, vector<1x16x8xf32>, vector<1x16x8xf32> -> vector<4x16x8xf32>
    %33 = vector.extract_strided_slice %21 {offsets = [0, 0], sizes = [16, 8], strides = [1, 1]} : vector<16x32xf32> to vector<16x8xf32>
    %34 = vector.shape_cast %33 : vector<16x8xf32> to vector<1x16x8xf32>
    %35 = vector.extract_strided_slice %21 {offsets = [0, 8], sizes = [16, 8], strides = [1, 1]} : vector<16x32xf32> to vector<16x8xf32>
    %36 = vector.shape_cast %35 : vector<16x8xf32> to vector<1x16x8xf32>
    %37 = vector.extract_strided_slice %21 {offsets = [0, 16], sizes = [16, 8], strides = [1, 1]} : vector<16x32xf32> to vector<16x8xf32>
    %38 = vector.shape_cast %37 : vector<16x8xf32> to vector<1x16x8xf32>
    %39 = vector.extract_strided_slice %21 {offsets = [0, 24], sizes = [16, 8], strides = [1, 1]} : vector<16x32xf32> to vector<16x8xf32>
    %40 = vector.shape_cast %39 : vector<16x8xf32> to vector<1x16x8xf32>
    %41 = tpu.concatenate %34, %36, %38, %40 in 0 : vector<1x16x8xf32>, vector<1x16x8xf32>, vector<1x16x8xf32>, vector<1x16x8xf32> -> vector<4x16x8xf32>
    %42 = vector.extract_strided_slice %19 {offsets = [0, 0], sizes = [16, 8], strides = [1, 1]} : vector<16x32xf32> to vector<16x8xf32>
    %43 = vector.shape_cast %42 : vector<16x8xf32> to vector<1x16x8xf32>
    %44 = vector.extract_strided_slice %19 {offsets = [0, 8], sizes = [16, 8], strides = [1, 1]} : vector<16x32xf32> to vector<16x8xf32>
    %45 = vector.shape_cast %44 : vector<16x8xf32> to vector<1x16x8xf32>
    %46 = vector.extract_strided_slice %19 {offsets = [0, 16], sizes = [16, 8], strides = [1, 1]} : vector<16x32xf32> to vector<16x8xf32>
    %47 = vector.shape_cast %46 : vector<16x8xf32> to vector<1x16x8xf32>
    %48 = vector.extract_strided_slice %19 {offsets = [0, 24], sizes = [16, 8], strides = [1, 1]} : vector<16x32xf32> to vector<16x8xf32>
    %49 = vector.shape_cast %48 : vector<16x8xf32> to vector<1x16x8xf32>
    %50 = tpu.concatenate %43, %45, %47, %49 in 0 : vector<1x16x8xf32>, vector<1x16x8xf32>, vector<1x16x8xf32>, vector<1x16x8xf32> -> vector<4x16x8xf32>
    "tpu.trace_start"() <{level = 10 : i32, message = "hqd,hkd->hqk"}> : () -> ()
    %cst_23 = arith.constant dense<0.000000e+00> : vector<4x16x16xf32>
    %51 = tpu.matmul %32, %41, %cst_23 {dimension_numbers = #tpu.dot_dimension_numbers<[2], [2], [1], [1], [0, 0, 0, 1, 1, 1], [0], [0]>} : vector<4x16x8xf32>, vector<4x16x8xf32>, vector<4x16x16xf32> -> vector<4x16x16xf32>
    "tpu.trace_stop"() : () -> ()
    %cst_24 = arith.constant dense<0xFF800000> : vector<4x16xf32>
    %52 = vector.multi_reduction <maximumf>, %51, %cst_24 [2] : vector<4x16x16xf32> to vector<4x16xf32>
    %53 = vector.shape_cast %52 : vector<4x16xf32> to vector<4x16x1xf32>
    %54 = vector.broadcast %53 : vector<4x16x1xf32> to vector<4x16x16xf32>
    %55 = arith.subf %51, %54 : vector<4x16x16xf32>
    %56 = math.exp %55 : vector<4x16x16xf32>
    %cst_25 = arith.constant dense<0.000000e+00> : vector<4x16xf32>
    %57 = vector.multi_reduction <add>, %56, %cst_25 [2] : vector<4x16x16xf32> to vector<4x16xf32>
    %58 = vector.shape_cast %57 : vector<4x16xf32> to vector<4x16x1xf32>
    %59 = tpu.reciprocal %58 {approx = true} : vector<4x16x1xf32> -> vector<4x16x1xf32>
    %60 = vector.broadcast %59 : vector<4x16x1xf32> to vector<4x16x16xf32>
    %61 = arith.mulf %56, %60 : vector<4x16x16xf32>
    "tpu.trace_start"() <{level = 10 : i32, message = "hqk,hkd->hqd"}> : () -> ()
    %cst_26 = arith.constant dense<0.000000e+00> : vector<4x16x8xf32>
    %62 = tpu.matmul %61, %50, %cst_26 {dimension_numbers = #tpu.dot_dimension_numbers<[2], [1], [1], [2], [0, 0, 0, 1, 1, 2], [0], [0]>} : vector<4x16x16xf32>, vector<4x16x8xf32>, vector<4x16x8xf32> -> vector<4x16x8xf32>
    "tpu.trace_stop"() : () -> ()
    %c0_27 = arith.constant 0 : index
    %c0_28 = arith.constant 0 : index
    %c0_29 = arith.constant 0 : index
    %63 = vector.load %arg10[%c0_27, %c0_28, %c0_29] : memref<4x8x32xf32, #tpu.memory_space<vmem>>, vector<4x8x32xf32>
    "tpu.trace_start"() <{level = 10 : i32, message = "hqd,hde->hqe"}> : () -> ()
    %cst_30 = arith.constant dense<0.000000e+00> : vector<4x16x32xf32>
    %64 = tpu.matmul %62, %63, %cst_30 {dimension_numbers = #tpu.dot_dimension_numbers<[2], [1], [1], [2], [0, 0, 0, 1, 1, 2], [0], [0]>} : vector<4x16x8xf32>, vector<4x8x32xf32>, vector<4x16x32xf32> -> vector<4x16x32xf32>
    "tpu.trace_stop"() : () -> ()
    %65 = vector.extract_strided_slice %64 {offsets = [0, 0, 0], sizes = [1, 16, 32], strides = [1, 1, 1]} : vector<4x16x32xf32> to vector<1x16x32xf32>
    %66 = vector.shape_cast %65 : vector<1x16x32xf32> to vector<16x32xf32>
    %67 = vector.extract_strided_slice %64 {offsets = [1, 0, 0], sizes = [1, 16, 32], strides = [1, 1, 1]} : vector<4x16x32xf32> to vector<1x16x32xf32>
    %68 = vector.shape_cast %67 : vector<1x16x32xf32> to vector<16x32xf32>
    %69 = arith.addf %66, %68 : vector<16x32xf32>
    %70 = vector.extract_strided_slice %64 {offsets = [2, 0, 0], sizes = [1, 16, 32], strides = [1, 1, 1]} : vector<4x16x32xf32> to vector<1x16x32xf32>
    %71 = vector.shape_cast %70 : vector<1x16x32xf32> to vector<16x32xf32>
    %72 = arith.addf %69, %71 : vector<16x32xf32>
    %73 = vector.extract_strided_slice %64 {offsets = [3, 0, 0], sizes = [1, 16, 32], strides = [1, 1, 1]} : vector<4x16x32xf32> to vector<1x16x32xf32>
    %74 = vector.shape_cast %73 : vector<1x16x32xf32> to vector<16x32xf32>
    %75 = arith.addf %72, %74 : vector<16x32xf32>
    %c0_31 = arith.constant 0 : index
    %c0_32 = arith.constant 0 : index
    %76 = vector.load %arg11[%c0_31, %c0_32] : memref<1x32xf32, #tpu.memory_space<vmem>>, vector<1x32xf32>
    %77 = vector.broadcast %76 : vector<1x32xf32> to vector<16x32xf32>
    %78 = arith.addf %75, %77 : vector<16x32xf32>
    %79 = vector.extract_strided_slice %8 {offsets = [0, 0], sizes = [1, 32], strides = [1, 1]} : vector<6x32xf32> to vector<1x32xf32>
    %80 = vector.extract_strided_slice %8 {offsets = [3, 0], sizes = [1, 32], strides = [1, 1]} : vector<6x32xf32> to vector<1x32xf32>
    %81 = arith.addf %1, %78 : vector<16x32xf32>
    %cst_33 = arith.constant dense<0.000000e+00> : vector<16xf32>
    %82 = vector.multi_reduction <add>, %81, %cst_33 [1] : vector<16x32xf32> to vector<16xf32>
    %83 = vector.shape_cast %82 : vector<16xf32> to vector<16x1xf32>
    %cst_34 = arith.constant 3.200000e+01 : f32
    %84 = vector.broadcast %cst_34 : f32 to vector<16x1xf32>
    %85 = arith.divf %83, %84 : vector<16x1xf32>
    %86 = arith.mulf %81, %81 : vector<16x32xf32>
    %cst_35 = arith.constant dense<0.000000e+00> : vector<16xf32>
    %87 = vector.multi_reduction <add>, %86, %cst_35 [1] : vector<16x32xf32> to vector<16xf32>
    %88 = vector.shape_cast %87 : vector<16xf32> to vector<16x1xf32>
    %cst_36 = arith.constant 3.200000e+01 : f32
    %89 = vector.broadcast %cst_36 : f32 to vector<16x1xf32>
    %90 = arith.divf %88, %89 : vector<16x1xf32>
    %91 = arith.mulf %85, %85 : vector<16x1xf32>
    %92 = arith.subf %90, %91 : vector<16x1xf32>
    %93 = vector.broadcast %85 : vector<16x1xf32> to vector<16x32xf32>
    %94 = arith.subf %81, %93 : vector<16x32xf32>
    %cst_37 = arith.constant 9.99999974E-6 : f32
    %95 = vector.broadcast %cst_37 : f32 to vector<16x1xf32>
    %96 = arith.addf %92, %95 : vector<16x1xf32>
    %97 = math.rsqrt %96 : vector<16x1xf32>
    %98 = vector.broadcast %97 : vector<16x1xf32> to vector<16x32xf32>
    %99 = arith.mulf %94, %98 : vector<16x32xf32>
    %100 = vector.broadcast %79 : vector<1x32xf32> to vector<16x32xf32>
    %101 = arith.mulf %99, %100 : vector<16x32xf32>
    %102 = vector.broadcast %80 : vector<1x32xf32> to vector<16x32xf32>
    %103 = arith.addf %101, %102 : vector<16x32xf32>
    %104 = arith.addf %103, %3 : vector<16x32xf32>
    %c0_38 = arith.constant 0 : index
    %c0_39 = arith.constant 0 : index
    %105 = vector.load %arg12[%c0_38, %c0_39] : memref<32x32xf32, #tpu.memory_space<vmem>>, vector<32x32xf32>
    %cst_40 = arith.constant dense<0.000000e+00> : vector<16x32xf32>
    %106 = tpu.matmul %104, %105, %cst_40 {dimension_numbers = #tpu.dot_dimension_numbers<[1], [0], [0], [1], [0, 0, 1, 1], [], []>} : vector<16x32xf32>, vector<32x32xf32>, vector<16x32xf32> -> vector<16x32xf32>
    %c0_41 = arith.constant 0 : index
    %c0_42 = arith.constant 0 : index
    %107 = vector.load %arg13[%c0_41, %c0_42] : memref<1x32xf32, #tpu.memory_space<vmem>>, vector<1x32xf32>
    %108 = vector.broadcast %107 : vector<1x32xf32> to vector<16x32xf32>
    %109 = arith.addf %106, %108 : vector<16x32xf32>
    %110 = arith.addf %5, %7 : vector<16x32xf32>
    %c0_43 = arith.constant 0 : index
    %c0_44 = arith.constant 0 : index
    %111 = vector.load %arg14[%c0_43, %c0_44] : memref<32x32xf32, #tpu.memory_space<vmem>>, vector<32x32xf32>
    %cst_45 = arith.constant dense<0.000000e+00> : vector<16x32xf32>
    %112 = tpu.matmul %110, %111, %cst_45 {dimension_numbers = #tpu.dot_dimension_numbers<[1], [0], [0], [1], [0, 0, 1, 1], [], []>} : vector<16x32xf32>, vector<32x32xf32>, vector<16x32xf32> -> vector<16x32xf32>
    %c0_46 = arith.constant 0 : index
    %c0_47 = arith.constant 0 : index
    %113 = vector.load %arg15[%c0_46, %c0_47] : memref<1x32xf32, #tpu.memory_space<vmem>>, vector<1x32xf32>
    %114 = vector.broadcast %113 : vector<1x32xf32> to vector<16x32xf32>
    %115 = arith.addf %112, %114 : vector<16x32xf32>
    %c0_48 = arith.constant 0 : index
    %c0_49 = arith.constant 0 : index
    %116 = vector.load %arg16[%c0_48, %c0_49] : memref<32x32xf32, #tpu.memory_space<vmem>>, vector<32x32xf32>
    %cst_50 = arith.constant dense<0.000000e+00> : vector<16x32xf32>
    %117 = tpu.matmul %5, %116, %cst_50 {dimension_numbers = #tpu.dot_dimension_numbers<[1], [0], [0], [1], [0, 0, 1, 1], [], []>} : vector<16x32xf32>, vector<32x32xf32>, vector<16x32xf32> -> vector<16x32xf32>
    %c0_51 = arith.constant 0 : index
    %c0_52 = arith.constant 0 : index
    %118 = vector.load %arg17[%c0_51, %c0_52] : memref<1x32xf32, #tpu.memory_space<vmem>>, vector<1x32xf32>
    %119 = vector.broadcast %118 : vector<1x32xf32> to vector<16x32xf32>
    %120 = arith.addf %117, %119 : vector<16x32xf32>
    %cst_53 = arith.constant 0.353553385 : f32
    %121 = vector.broadcast %cst_53 : f32 to vector<16x32xf32>
    %122 = arith.mulf %109, %121 : vector<16x32xf32>
    %123 = vector.extract_strided_slice %122 {offsets = [0, 0], sizes = [16, 8], strides = [1, 1]} : vector<16x32xf32> to vector<16x8xf32>
    %124 = vector.shape_cast %123 : vector<16x8xf32> to vector<1x16x8xf32>
    %125 = vector.extract_strided_slice %122 {offsets = [0, 8], sizes = [16, 8], strides = [1, 1]} : vector<16x32xf32> to vector<16x8xf32>
    %126 = vector.shape_cast %125 : vector<16x8xf32> to vector<1x16x8xf32>
    %127 = vector.extract_strided_slice %122 {offsets = [0, 16], sizes = [16, 8], strides = [1, 1]} : vector<16x32xf32> to vector<16x8xf32>
    %128 = vector.shape_cast %127 : vector<16x8xf32> to vector<1x16x8xf32>
    %129 = vector.extract_strided_slice %122 {offsets = [0, 24], sizes = [16, 8], strides = [1, 1]} : vector<16x32xf32> to vector<16x8xf32>
    %130 = vector.shape_cast %129 : vector<16x8xf32> to vector<1x16x8xf32>
    %131 = tpu.concatenate %124, %126, %128, %130 in 0 : vector<1x16x8xf32>, vector<1x16x8xf32>, vector<1x16x8xf32>, vector<1x16x8xf32> -> vector<4x16x8xf32>
    %132 = vector.extract_strided_slice %115 {offsets = [0, 0], sizes = [16, 8], strides = [1, 1]} : vector<16x32xf32> to vector<16x8xf32>
    %133 = vector.shape_cast %132 : vector<16x8xf32> to vector<1x16x8xf32>
    %134 = vector.extract_strided_slice %115 {offsets = [0, 8], sizes = [16, 8], strides = [1, 1]} : vector<16x32xf32> to vector<16x8xf32>
    %135 = vector.shape_cast %134 : vector<16x8xf32> to vector<1x16x8xf32>
    %136 = vector.extract_strided_slice %115 {offsets = [0, 16], sizes = [16, 8], strides = [1, 1]} : vector<16x32xf32> to vector<16x8xf32>
    %137 = vector.shape_cast %136 : vector<16x8xf32> to vector<1x16x8xf32>
    %138 = vector.extract_strided_slice %115 {offsets = [0, 24], sizes = [16, 8], strides = [1, 1]} : vector<16x32xf32> to vector<16x8xf32>
    %139 = vector.shape_cast %138 : vector<16x8xf32> to vector<1x16x8xf32>
    %140 = tpu.concatenate %133, %135, %137, %139 in 0 : vector<1x16x8xf32>, vector<1x16x8xf32>, vector<1x16x8xf32>, vector<1x16x8xf32> -> vector<4x16x8xf32>
    %141 = vector.extract_strided_slice %120 {offsets = [0, 0], sizes = [16, 8], strides = [1, 1]} : vector<16x32xf32> to vector<16x8xf32>
    %142 = vector.shape_cast %141 : vector<16x8xf32> to vector<1x16x8xf32>
    %143 = vector.extract_strided_slice %120 {offsets = [0, 8], sizes = [16, 8], strides = [1, 1]} : vector<16x32xf32> to vector<16x8xf32>
    %144 = vector.shape_cast %143 : vector<16x8xf32> to vector<1x16x8xf32>
    %145 = vector.extract_strided_slice %120 {offsets = [0, 16], sizes = [16, 8], strides = [1, 1]} : vector<16x32xf32> to vector<16x8xf32>
    %146 = vector.shape_cast %145 : vector<16x8xf32> to vector<1x16x8xf32>
    %147 = vector.extract_strided_slice %120 {offsets = [0, 24], sizes = [16, 8], strides = [1, 1]} : vector<16x32xf32> to vector<16x8xf32>
    %148 = vector.shape_cast %147 : vector<16x8xf32> to vector<1x16x8xf32>
    %149 = tpu.concatenate %142, %144, %146, %148 in 0 : vector<1x16x8xf32>, vector<1x16x8xf32>, vector<1x16x8xf32>, vector<1x16x8xf32> -> vector<4x16x8xf32>
    "tpu.trace_start"() <{level = 10 : i32, message = "hqd,hkd->hqk"}> : () -> ()
    %cst_54 = arith.constant dense<0.000000e+00> : vector<4x16x16xf32>
    %150 = tpu.matmul %131, %140, %cst_54 {dimension_numbers = #tpu.dot_dimension_numbers<[2], [2], [1], [1], [0, 0, 0, 1, 1, 1], [0], [0]>} : vector<4x16x8xf32>, vector<4x16x8xf32>, vector<4x16x16xf32> -> vector<4x16x16xf32>
    "tpu.trace_stop"() : () -> ()
    %cst_55 = arith.constant dense<0xFF800000> : vector<4x16xf32>
    %151 = vector.multi_reduction <maximumf>, %150, %cst_55 [2] : vector<4x16x16xf32> to vector<4x16xf32>
    %152 = vector.shape_cast %151 : vector<4x16xf32> to vector<4x16x1xf32>
    %153 = vector.broadcast %152 : vector<4x16x1xf32> to vector<4x16x16xf32>
    %154 = arith.subf %150, %153 : vector<4x16x16xf32>
    %155 = math.exp %154 : vector<4x16x16xf32>
    %cst_56 = arith.constant dense<0.000000e+00> : vector<4x16xf32>
    %156 = vector.multi_reduction <add>, %155, %cst_56 [2] : vector<4x16x16xf32> to vector<4x16xf32>
    %157 = vector.shape_cast %156 : vector<4x16xf32> to vector<4x16x1xf32>
    %158 = tpu.reciprocal %157 {approx = true} : vector<4x16x1xf32> -> vector<4x16x1xf32>
    %159 = vector.broadcast %158 : vector<4x16x1xf32> to vector<4x16x16xf32>
    %160 = arith.mulf %155, %159 : vector<4x16x16xf32>
    "tpu.trace_start"() <{level = 10 : i32, message = "hqk,hkd->hqd"}> : () -> ()
    %cst_57 = arith.constant dense<0.000000e+00> : vector<4x16x8xf32>
    %161 = tpu.matmul %160, %149, %cst_57 {dimension_numbers = #tpu.dot_dimension_numbers<[2], [1], [1], [2], [0, 0, 0, 1, 1, 2], [0], [0]>} : vector<4x16x16xf32>, vector<4x16x8xf32>, vector<4x16x8xf32> -> vector<4x16x8xf32>
    "tpu.trace_stop"() : () -> ()
    %c0_58 = arith.constant 0 : index
    %c0_59 = arith.constant 0 : index
    %c0_60 = arith.constant 0 : index
    %162 = vector.load %arg18[%c0_58, %c0_59, %c0_60] : memref<4x8x32xf32, #tpu.memory_space<vmem>>, vector<4x8x32xf32>
    "tpu.trace_start"() <{level = 10 : i32, message = "hqd,hde->hqe"}> : () -> ()
    %cst_61 = arith.constant dense<0.000000e+00> : vector<4x16x32xf32>
    %163 = tpu.matmul %161, %162, %cst_61 {dimension_numbers = #tpu.dot_dimension_numbers<[2], [1], [1], [2], [0, 0, 0, 1, 1, 2], [0], [0]>} : vector<4x16x8xf32>, vector<4x8x32xf32>, vector<4x16x32xf32> -> vector<4x16x32xf32>
    "tpu.trace_stop"() : () -> ()
    %164 = vector.extract_strided_slice %163 {offsets = [0, 0, 0], sizes = [1, 16, 32], strides = [1, 1, 1]} : vector<4x16x32xf32> to vector<1x16x32xf32>
    %165 = vector.shape_cast %164 : vector<1x16x32xf32> to vector<16x32xf32>
    %166 = vector.extract_strided_slice %163 {offsets = [1, 0, 0], sizes = [1, 16, 32], strides = [1, 1, 1]} : vector<4x16x32xf32> to vector<1x16x32xf32>
    %167 = vector.shape_cast %166 : vector<1x16x32xf32> to vector<16x32xf32>
    %168 = arith.addf %165, %167 : vector<16x32xf32>
    %169 = vector.extract_strided_slice %163 {offsets = [2, 0, 0], sizes = [1, 16, 32], strides = [1, 1, 1]} : vector<4x16x32xf32> to vector<1x16x32xf32>
    %170 = vector.shape_cast %169 : vector<1x16x32xf32> to vector<16x32xf32>
    %171 = arith.addf %168, %170 : vector<16x32xf32>
    %172 = vector.extract_strided_slice %163 {offsets = [3, 0, 0], sizes = [1, 16, 32], strides = [1, 1, 1]} : vector<4x16x32xf32> to vector<1x16x32xf32>
    %173 = vector.shape_cast %172 : vector<1x16x32xf32> to vector<16x32xf32>
    %174 = arith.addf %171, %173 : vector<16x32xf32>
    %c0_62 = arith.constant 0 : index
    %c0_63 = arith.constant 0 : index
    %175 = vector.load %arg19[%c0_62, %c0_63] : memref<1x32xf32, #tpu.memory_space<vmem>>, vector<1x32xf32>
    %176 = vector.broadcast %175 : vector<1x32xf32> to vector<16x32xf32>
    %177 = arith.addf %174, %176 : vector<16x32xf32>
    %178 = vector.extract_strided_slice %8 {offsets = [1, 0], sizes = [1, 32], strides = [1, 1]} : vector<6x32xf32> to vector<1x32xf32>
    %179 = vector.extract_strided_slice %8 {offsets = [4, 0], sizes = [1, 32], strides = [1, 1]} : vector<6x32xf32> to vector<1x32xf32>
    %180 = arith.addf %103, %177 : vector<16x32xf32>
    %cst_64 = arith.constant dense<0.000000e+00> : vector<16xf32>
    %181 = vector.multi_reduction <add>, %180, %cst_64 [1] : vector<16x32xf32> to vector<16xf32>
    %182 = vector.shape_cast %181 : vector<16xf32> to vector<16x1xf32>
    %cst_65 = arith.constant 3.200000e+01 : f32
    %183 = vector.broadcast %cst_65 : f32 to vector<16x1xf32>
    %184 = arith.divf %182, %183 : vector<16x1xf32>
    %185 = arith.mulf %180, %180 : vector<16x32xf32>
    %cst_66 = arith.constant dense<0.000000e+00> : vector<16xf32>
    %186 = vector.multi_reduction <add>, %185, %cst_66 [1] : vector<16x32xf32> to vector<16xf32>
    %187 = vector.shape_cast %186 : vector<16xf32> to vector<16x1xf32>
    %cst_67 = arith.constant 3.200000e+01 : f32
    %188 = vector.broadcast %cst_67 : f32 to vector<16x1xf32>
    %189 = arith.divf %187, %188 : vector<16x1xf32>
    %190 = arith.mulf %184, %184 : vector<16x1xf32>
    %191 = arith.subf %189, %190 : vector<16x1xf32>
    %192 = vector.broadcast %184 : vector<16x1xf32> to vector<16x32xf32>
    %193 = arith.subf %180, %192 : vector<16x32xf32>
    %cst_68 = arith.constant 9.99999974E-6 : f32
    %194 = vector.broadcast %cst_68 : f32 to vector<16x1xf32>
    %195 = arith.addf %191, %194 : vector<16x1xf32>
    %196 = math.rsqrt %195 : vector<16x1xf32>
    %197 = vector.broadcast %196 : vector<16x1xf32> to vector<16x32xf32>
    %198 = arith.mulf %193, %197 : vector<16x32xf32>
    %199 = vector.broadcast %178 : vector<1x32xf32> to vector<16x32xf32>
    %200 = arith.mulf %198, %199 : vector<16x32xf32>
    %201 = vector.broadcast %179 : vector<1x32xf32> to vector<16x32xf32>
    %202 = arith.addf %200, %201 : vector<16x32xf32>
    %c0_69 = arith.constant 0 : index
    %c0_70 = arith.constant 0 : index
    %203 = vector.load %arg5[%c0_69, %c0_70] : memref<16x4xf32, #tpu.memory_space<vmem>>, vector<16x4xf32>
    %204 = vector.extract_strided_slice %203 {offsets = [0, 0], sizes = [16, 1], strides = [1, 1]} : vector<16x4xf32> to vector<16x1xf32>
    %205 = vector.extract_strided_slice %203 {offsets = [0, 1], sizes = [16, 1], strides = [1, 1]} : vector<16x4xf32> to vector<16x1xf32>
    %206 = vector.extract_strided_slice %203 {offsets = [0, 2], sizes = [16, 1], strides = [1, 1]} : vector<16x4xf32> to vector<16x1xf32>
    %207 = vector.extract_strided_slice %203 {offsets = [0, 3], sizes = [16, 1], strides = [1, 1]} : vector<16x4xf32> to vector<16x1xf32>
    %c0_71 = arith.constant 0 : index
    %c0_72 = arith.constant 0 : index
    %208 = vector.load %arg21[%c0_71, %c0_72] : memref<9x32xf32, #tpu.memory_space<vmem>>, vector<9x32xf32>
    %209 = vector.broadcast %204 : vector<16x1xf32> to vector<16x32xf32>
    %210 = arith.mulf %202, %209 : vector<16x32xf32>
    %211 = vector.broadcast %205 : vector<16x1xf32> to vector<16x32xf32>
    %212 = arith.mulf %202, %211 : vector<16x32xf32>
    %c1_i32 = arith.constant 1 : i32
    %213 = tpu.dynamic_rotate %212 by %c1_i32 dim 0 : vector<16x32xf32>, i32 -> vector<16x32xf32>
    %c15_i32 = arith.constant 15 : i32
    %214 = tpu.dynamic_rotate %210 by %c15_i32 dim 0 : vector<16x32xf32>, i32 -> vector<16x32xf32>
    %215 = vector.extract_strided_slice %208 {offsets = [3, 0], sizes = [1, 32], strides = [1, 1]} : vector<9x32xf32> to vector<1x32xf32>
    %216 = vector.broadcast %215 : vector<1x32xf32> to vector<16x32xf32>
    %217 = arith.mulf %216, %213 : vector<16x32xf32>
    %218 = vector.extract_strided_slice %208 {offsets = [4, 0], sizes = [1, 32], strides = [1, 1]} : vector<9x32xf32> to vector<1x32xf32>
    %219 = vector.broadcast %218 : vector<1x32xf32> to vector<16x32xf32>
    %220 = arith.mulf %219, %202 : vector<16x32xf32>
    %221 = arith.addf %217, %220 : vector<16x32xf32>
    %222 = vector.extract_strided_slice %208 {offsets = [5, 0], sizes = [1, 32], strides = [1, 1]} : vector<9x32xf32> to vector<1x32xf32>
    %223 = vector.broadcast %222 : vector<1x32xf32> to vector<16x32xf32>
    %224 = arith.mulf %223, %214 : vector<16x32xf32>
    %225 = arith.addf %221, %224 : vector<16x32xf32>
    %226 = vector.extract_strided_slice %208 {offsets = [0, 0], sizes = [1, 32], strides = [1, 1]} : vector<9x32xf32> to vector<1x32xf32>
    %227 = vector.broadcast %226 : vector<1x32xf32> to vector<16x32xf32>
    %228 = arith.mulf %227, %213 : vector<16x32xf32>
    %229 = vector.extract_strided_slice %208 {offsets = [1, 0], sizes = [1, 32], strides = [1, 1]} : vector<9x32xf32> to vector<1x32xf32>
    %230 = vector.broadcast %229 : vector<1x32xf32> to vector<16x32xf32>
    %231 = arith.mulf %230, %202 : vector<16x32xf32>
    %232 = arith.addf %228, %231 : vector<16x32xf32>
    %233 = vector.extract_strided_slice %208 {offsets = [2, 0], sizes = [1, 32], strides = [1, 1]} : vector<9x32xf32> to vector<1x32xf32>
    %234 = vector.broadcast %233 : vector<1x32xf32> to vector<16x32xf32>
    %235 = arith.mulf %234, %214 : vector<16x32xf32>
    %236 = arith.addf %232, %235 : vector<16x32xf32>
    %c4_i32 = arith.constant 4 : i32
    %237 = tpu.dynamic_rotate %236 by %c4_i32 dim 0 : vector<16x32xf32>, i32 -> vector<16x32xf32>
    %238 = vector.broadcast %206 : vector<16x1xf32> to vector<16x32xf32>
    %239 = arith.mulf %237, %238 : vector<16x32xf32>
    %240 = arith.addf %225, %239 : vector<16x32xf32>
    %241 = vector.extract_strided_slice %208 {offsets = [6, 0], sizes = [1, 32], strides = [1, 1]} : vector<9x32xf32> to vector<1x32xf32>
    %242 = vector.broadcast %241 : vector<1x32xf32> to vector<16x32xf32>
    %243 = arith.mulf %242, %213 : vector<16x32xf32>
    %244 = vector.extract_strided_slice %208 {offsets = [7, 0], sizes = [1, 32], strides = [1, 1]} : vector<9x32xf32> to vector<1x32xf32>
    %245 = vector.broadcast %244 : vector<1x32xf32> to vector<16x32xf32>
    %246 = arith.mulf %245, %202 : vector<16x32xf32>
    %247 = arith.addf %243, %246 : vector<16x32xf32>
    %248 = vector.extract_strided_slice %208 {offsets = [8, 0], sizes = [1, 32], strides = [1, 1]} : vector<9x32xf32> to vector<1x32xf32>
    %249 = vector.broadcast %248 : vector<1x32xf32> to vector<16x32xf32>
    %250 = arith.mulf %249, %214 : vector<16x32xf32>
    %251 = arith.addf %247, %250 : vector<16x32xf32>
    %c12_i32 = arith.constant 12 : i32
    %252 = tpu.dynamic_rotate %251 by %c12_i32 dim 0 : vector<16x32xf32>, i32 -> vector<16x32xf32>
    %253 = vector.broadcast %207 : vector<16x1xf32> to vector<16x32xf32>
    %254 = arith.mulf %252, %253 : vector<16x32xf32>
    %255 = arith.addf %240, %254 : vector<16x32xf32>
    %c0_73 = arith.constant 0 : index
    %c0_74 = arith.constant 0 : index
    %256 = vector.load %arg22[%c0_73, %c0_74] : memref<32x64xf32, #tpu.memory_space<vmem>>, vector<32x64xf32>
    %cst_75 = arith.constant dense<0.000000e+00> : vector<16x64xf32>
    %257 = tpu.matmul %255, %256, %cst_75 {dimension_numbers = #tpu.dot_dimension_numbers<[1], [0], [0], [1], [0, 0, 1, 1], [], []>} : vector<16x32xf32>, vector<32x64xf32>, vector<16x64xf32> -> vector<16x64xf32>
    %c0_76 = arith.constant 0 : index
    %c0_77 = arith.constant 0 : index
    %258 = vector.load %arg23[%c0_76, %c0_77] : memref<1x64xf32, #tpu.memory_space<vmem>>, vector<1x64xf32>
    %259 = vector.broadcast %258 : vector<1x64xf32> to vector<16x64xf32>
    %260 = arith.addf %257, %259 : vector<16x64xf32>
    %cst_78 = arith.constant 0.000000e+00 : f32
    %261 = vector.broadcast %cst_78 : f32 to vector<16x64xf32>
    %262 = arith.maximumf %260, %261 : vector<16x64xf32>
    %c0_79 = arith.constant 0 : index
    %c0_80 = arith.constant 0 : index
    %263 = vector.load %arg24[%c0_79, %c0_80] : memref<9x64xf32, #tpu.memory_space<vmem>>, vector<9x64xf32>
    %264 = vector.broadcast %204 : vector<16x1xf32> to vector<16x64xf32>
    %265 = arith.mulf %262, %264 : vector<16x64xf32>
    %266 = vector.broadcast %205 : vector<16x1xf32> to vector<16x64xf32>
    %267 = arith.mulf %262, %266 : vector<16x64xf32>
    %c1_i32_81 = arith.constant 1 : i32
    %268 = tpu.dynamic_rotate %267 by %c1_i32_81 dim 0 : vector<16x64xf32>, i32 -> vector<16x64xf32>
    %c15_i32_82 = arith.constant 15 : i32
    %269 = tpu.dynamic_rotate %265 by %c15_i32_82 dim 0 : vector<16x64xf32>, i32 -> vector<16x64xf32>
    %270 = vector.extract_strided_slice %263 {offsets = [3, 0], sizes = [1, 64], strides = [1, 1]} : vector<9x64xf32> to vector<1x64xf32>
    %271 = vector.broadcast %270 : vector<1x64xf32> to vector<16x64xf32>
    %272 = arith.mulf %271, %268 : vector<16x64xf32>
    %273 = vector.extract_strided_slice %263 {offsets = [4, 0], sizes = [1, 64], strides = [1, 1]} : vector<9x64xf32> to vector<1x64xf32>
    %274 = vector.broadcast %273 : vector<1x64xf32> to vector<16x64xf32>
    %275 = arith.mulf %274, %262 : vector<16x64xf32>
    %276 = arith.addf %272, %275 : vector<16x64xf32>
    %277 = vector.extract_strided_slice %263 {offsets = [5, 0], sizes = [1, 64], strides = [1, 1]} : vector<9x64xf32> to vector<1x64xf32>
    %278 = vector.broadcast %277 : vector<1x64xf32> to vector<16x64xf32>
    %279 = arith.mulf %278, %269 : vector<16x64xf32>
    %280 = arith.addf %276, %279 : vector<16x64xf32>
    %281 = vector.extract_strided_slice %263 {offsets = [0, 0], sizes = [1, 64], strides = [1, 1]} : vector<9x64xf32> to vector<1x64xf32>
    %282 = vector.broadcast %281 : vector<1x64xf32> to vector<16x64xf32>
    %283 = arith.mulf %282, %268 : vector<16x64xf32>
    %284 = vector.extract_strided_slice %263 {offsets = [1, 0], sizes = [1, 64], strides = [1, 1]} : vector<9x64xf32> to vector<1x64xf32>
    %285 = vector.broadcast %284 : vector<1x64xf32> to vector<16x64xf32>
    %286 = arith.mulf %285, %262 : vector<16x64xf32>
    %287 = arith.addf %283, %286 : vector<16x64xf32>
    %288 = vector.extract_strided_slice %263 {offsets = [2, 0], sizes = [1, 64], strides = [1, 1]} : vector<9x64xf32> to vector<1x64xf32>
    %289 = vector.broadcast %288 : vector<1x64xf32> to vector<16x64xf32>
    %290 = arith.mulf %289, %269 : vector<16x64xf32>
    %291 = arith.addf %287, %290 : vector<16x64xf32>
    %c4_i32_83 = arith.constant 4 : i32
    %292 = tpu.dynamic_rotate %291 by %c4_i32_83 dim 0 : vector<16x64xf32>, i32 -> vector<16x64xf32>
    %293 = vector.broadcast %206 : vector<16x1xf32> to vector<16x64xf32>
    %294 = arith.mulf %292, %293 : vector<16x64xf32>
    %295 = arith.addf %280, %294 : vector<16x64xf32>
    %296 = vector.extract_strided_slice %263 {offsets = [6, 0], sizes = [1, 64], strides = [1, 1]} : vector<9x64xf32> to vector<1x64xf32>
    %297 = vector.broadcast %296 : vector<1x64xf32> to vector<16x64xf32>
    %298 = arith.mulf %297, %268 : vector<16x64xf32>
    %299 = vector.extract_strided_slice %263 {offsets = [7, 0], sizes = [1, 64], strides = [1, 1]} : vector<9x64xf32> to vector<1x64xf32>
    %300 = vector.broadcast %299 : vector<1x64xf32> to vector<16x64xf32>
    %301 = arith.mulf %300, %262 : vector<16x64xf32>
    %302 = arith.addf %298, %301 : vector<16x64xf32>
    %303 = vector.extract_strided_slice %263 {offsets = [8, 0], sizes = [1, 64], strides = [1, 1]} : vector<9x64xf32> to vector<1x64xf32>
    %304 = vector.broadcast %303 : vector<1x64xf32> to vector<16x64xf32>
    %305 = arith.mulf %304, %269 : vector<16x64xf32>
    %306 = arith.addf %302, %305 : vector<16x64xf32>
    %c12_i32_84 = arith.constant 12 : i32
    %307 = tpu.dynamic_rotate %306 by %c12_i32_84 dim 0 : vector<16x64xf32>, i32 -> vector<16x64xf32>
    %308 = vector.broadcast %207 : vector<16x1xf32> to vector<16x64xf32>
    %309 = arith.mulf %307, %308 : vector<16x64xf32>
    %310 = arith.addf %295, %309 : vector<16x64xf32>
    %c0_85 = arith.constant 0 : index
    %c0_86 = arith.constant 0 : index
    %311 = vector.load %arg25[%c0_85, %c0_86] : memref<64x32xf32, #tpu.memory_space<vmem>>, vector<64x32xf32>
    %cst_87 = arith.constant dense<0.000000e+00> : vector<16x32xf32>
    %312 = tpu.matmul %310, %311, %cst_87 {dimension_numbers = #tpu.dot_dimension_numbers<[1], [0], [0], [1], [0, 0, 1, 1], [], []>} : vector<16x64xf32>, vector<64x32xf32>, vector<16x32xf32> -> vector<16x32xf32>
    %c0_88 = arith.constant 0 : index
    %c0_89 = arith.constant 0 : index
    %313 = vector.load %arg26[%c0_88, %c0_89] : memref<1x32xf32, #tpu.memory_space<vmem>>, vector<1x32xf32>
    %314 = vector.broadcast %313 : vector<1x32xf32> to vector<16x32xf32>
    %315 = arith.addf %312, %314 : vector<16x32xf32>
    %316 = vector.extract_strided_slice %8 {offsets = [2, 0], sizes = [1, 32], strides = [1, 1]} : vector<6x32xf32> to vector<1x32xf32>
    %317 = vector.extract_strided_slice %8 {offsets = [5, 0], sizes = [1, 32], strides = [1, 1]} : vector<6x32xf32> to vector<1x32xf32>
    %318 = arith.addf %202, %315 : vector<16x32xf32>
    %cst_90 = arith.constant dense<0.000000e+00> : vector<16xf32>
    %319 = vector.multi_reduction <add>, %318, %cst_90 [1] : vector<16x32xf32> to vector<16xf32>
    %320 = vector.shape_cast %319 : vector<16xf32> to vector<16x1xf32>
    %cst_91 = arith.constant 3.200000e+01 : f32
    %321 = vector.broadcast %cst_91 : f32 to vector<16x1xf32>
    %322 = arith.divf %320, %321 : vector<16x1xf32>
    %323 = arith.mulf %318, %318 : vector<16x32xf32>
    %cst_92 = arith.constant dense<0.000000e+00> : vector<16xf32>
    %324 = vector.multi_reduction <add>, %323, %cst_92 [1] : vector<16x32xf32> to vector<16xf32>
    %325 = vector.shape_cast %324 : vector<16xf32> to vector<16x1xf32>
    %cst_93 = arith.constant 3.200000e+01 : f32
    %326 = vector.broadcast %cst_93 : f32 to vector<16x1xf32>
    %327 = arith.divf %325, %326 : vector<16x1xf32>
    %328 = arith.mulf %322, %322 : vector<16x1xf32>
    %329 = arith.subf %327, %328 : vector<16x1xf32>
    %330 = vector.broadcast %322 : vector<16x1xf32> to vector<16x32xf32>
    %331 = arith.subf %318, %330 : vector<16x32xf32>
    %cst_94 = arith.constant 9.99999974E-6 : f32
    %332 = vector.broadcast %cst_94 : f32 to vector<16x1xf32>
    %333 = arith.addf %329, %332 : vector<16x1xf32>
    %334 = math.rsqrt %333 : vector<16x1xf32>
    %335 = vector.broadcast %334 : vector<16x1xf32> to vector<16x32xf32>
    %336 = arith.mulf %331, %335 : vector<16x32xf32>
    %337 = vector.broadcast %316 : vector<1x32xf32> to vector<16x32xf32>
    %338 = arith.mulf %336, %337 : vector<16x32xf32>
    %339 = vector.broadcast %317 : vector<1x32xf32> to vector<16x32xf32>
    %340 = arith.addf %338, %339 : vector<16x32xf32>
    %c0_95 = arith.constant 0 : index
    %c0_96 = arith.constant 0 : index
    %c0_97 = arith.constant 0 : index
    %341 = vector.load %arg27[%c0_95, %c0_96, %c0_97] : memref<1x16x32xf32, #tpu.memory_space<vmem>>, vector<1x16x32xf32>
    %342 = vector.shape_cast %341 : vector<1x16x32xf32> to vector<16x32xf32>
    %343 = vector.shape_cast %340 : vector<16x32xf32> to vector<1x16x32xf32>
    tpu.vector_store %arg27[%c0_95, %c0_96, %c0_97], %343 {strides = array<i32>} : memref<1x16x32xf32, #tpu.memory_space<vmem>>, vector<1x16x32xf32>,
    return
  }
  func.func @transform_0(%arg0: i32) -> (i32, i32, i32) {
    %c0_i32 = arith.constant 0 : i32
    %c0_i32_0 = arith.constant 0 : i32
    %c0_i32_1 = arith.constant 0 : i32
    return %arg0, %c0_i32, %c0_i32_0 : i32, i32, i32
  }
  func.func @transform_1(%arg0: i32) -> (i32, i32, i32) {
    %c0_i32 = arith.constant 0 : i32
    %c0_i32_0 = arith.constant 0 : i32
    %c0_i32_1 = arith.constant 0 : i32
    return %arg0, %c0_i32, %c0_i32_0 : i32, i32, i32
  }
  func.func @transform_2(%arg0: i32) -> (i32, i32, i32) {
    %c0_i32 = arith.constant 0 : i32
    %c0_i32_0 = arith.constant 0 : i32
    %c0_i32_1 = arith.constant 0 : i32
    return %arg0, %c0_i32, %c0_i32_0 : i32, i32, i32
  }
  func.func @transform_3(%arg0: i32) -> (i32, i32, i32) {
    %c0_i32 = arith.constant 0 : i32
    %c0_i32_0 = arith.constant 0 : i32
    %c0_i32_1 = arith.constant 0 : i32
    return %arg0, %c0_i32, %c0_i32_0 : i32, i32, i32
  }
  func.func @transform_4(%arg0: i32) -> (i32, i32) {
    %c0_i32 = arith.constant 0 : i32
    %c0_i32_0 = arith.constant 0 : i32
    %c0_i32_1 = arith.constant 0 : i32
    return %c0_i32, %c0_i32_0 : i32, i32
  }
  func.func @transform_5(%arg0: i32) -> (i32, i32) {
    %c0_i32 = arith.constant 0 : i32
    %c0_i32_0 = arith.constant 0 : i32
    %c0_i32_1 = arith.constant 0 : i32
    return %c0_i32, %c0_i32_0 : i32, i32
  }
  func.func @transform_6(%arg0: i32) -> (i32, i32) {
    %c0_i32 = arith.constant 0 : i32
    %c0_i32_0 = arith.constant 0 : i32
    %c0_i32_1 = arith.constant 0 : i32
    return %c0_i32, %c0_i32_0 : i32, i32
  }
  func.func @transform_7(%arg0: i32) -> (i32, i32) {
    %c0_i32 = arith.constant 0 : i32
    %c0_i32_0 = arith.constant 0 : i32
    %c0_i32_1 = arith.constant 0 : i32
    return %c0_i32, %c0_i32_0 : i32, i32
  }
  func.func @transform_8(%arg0: i32) -> (i32, i32) {
    %c0_i32 = arith.constant 0 : i32
    %c0_i32_0 = arith.constant 0 : i32
    %c0_i32_1 = arith.constant 0 : i32
    return %c0_i32, %c0_i32_0 : i32, i32
  }
  func.func @transform_9(%arg0: i32) -> (i32, i32, i32) {
    %c0_i32 = arith.constant 0 : i32
    %c0_i32_0 = arith.constant 0 : i32
    %c0_i32_1 = arith.constant 0 : i32
    %c0_i32_2 = arith.constant 0 : i32
    return %c0_i32, %c0_i32_0, %c0_i32_1 : i32, i32, i32
  }
  func.func @transform_10(%arg0: i32) -> (i32, i32) {
    %c0_i32 = arith.constant 0 : i32
    %c0_i32_0 = arith.constant 0 : i32
    %c0_i32_1 = arith.constant 0 : i32
    return %c0_i32, %c0_i32_0 : i32, i32
  }
  func.func @transform_11(%arg0: i32) -> (i32, i32) {
    %c0_i32 = arith.constant 0 : i32
    %c0_i32_0 = arith.constant 0 : i32
    %c0_i32_1 = arith.constant 0 : i32
    return %c0_i32, %c0_i32_0 : i32, i32
  }
  func.func @transform_12(%arg0: i32) -> (i32, i32) {
    %c0_i32 = arith.constant 0 : i32
    %c0_i32_0 = arith.constant 0 : i32
    %c0_i32_1 = arith.constant 0 : i32
    return %c0_i32, %c0_i32_0 : i32, i32
  }
  func.func @transform_13(%arg0: i32) -> (i32, i32) {
    %c0_i32 = arith.constant 0 : i32
    %c0_i32_0 = arith.constant 0 : i32
    %c0_i32_1 = arith.constant 0 : i32
    return %c0_i32, %c0_i32_0 : i32, i32
  }
  func.func @transform_14(%arg0: i32) -> (i32, i32) {
    %c0_i32 = arith.constant 0 : i32
    %c0_i32_0 = arith.constant 0 : i32
    %c0_i32_1 = arith.constant 0 : i32
    return %c0_i32, %c0_i32_0 : i32, i32
  }
  func.func @transform_15(%arg0: i32) -> (i32, i32) {
    %c0_i32 = arith.constant 0 : i32
    %c0_i32_0 = arith.constant 0 : i32
    %c0_i32_1 = arith.constant 0 : i32
    return %c0_i32, %c0_i32_0 : i32, i32
  }
  func.func @transform_16(%arg0: i32) -> (i32, i32) {
    %c0_i32 = arith.constant 0 : i32
    %c0_i32_0 = arith.constant 0 : i32
    %c0_i32_1 = arith.constant 0 : i32
    return %c0_i32, %c0_i32_0 : i32, i32
  }
  func.func @transform_17(%arg0: i32) -> (i32, i32, i32) {
    %c0_i32 = arith.constant 0 : i32
    %c0_i32_0 = arith.constant 0 : i32
    %c0_i32_1 = arith.constant 0 : i32
    %c0_i32_2 = arith.constant 0 : i32
    return %c0_i32, %c0_i32_0, %c0_i32_1 : i32, i32, i32
  }
  func.func @transform_18(%arg0: i32) -> (i32, i32) {
    %c0_i32 = arith.constant 0 : i32
    %c0_i32_0 = arith.constant 0 : i32
    %c0_i32_1 = arith.constant 0 : i32
    return %c0_i32, %c0_i32_0 : i32, i32
  }
  func.func @transform_19(%arg0: i32) -> (i32, i32) {
    %c0_i32 = arith.constant 0 : i32
    %c0_i32_0 = arith.constant 0 : i32
    %c0_i32_1 = arith.constant 0 : i32
    return %c0_i32, %c0_i32_0 : i32, i32
  }
  func.func @transform_20(%arg0: i32) -> (i32, i32) {
    %c0_i32 = arith.constant 0 : i32
    %c0_i32_0 = arith.constant 0 : i32
    %c0_i32_1 = arith.constant 0 : i32
    return %c0_i32, %c0_i32_0 : i32, i32
  }
  func.func @transform_21(%arg0: i32) -> (i32, i32) {
    %c0_i32 = arith.constant 0 : i32
    %c0_i32_0 = arith.constant 0 : i32
    %c0_i32_1 = arith.constant 0 : i32
    return %c0_i32, %c0_i32_0 : i32, i32
  }
  func.func @transform_22(%arg0: i32) -> (i32, i32) {
    %c0_i32 = arith.constant 0 : i32
    %c0_i32_0 = arith.constant 0 : i32
    %c0_i32_1 = arith.constant 0 : i32
    return %c0_i32, %c0_i32_0 : i32, i32
  }
  func.func @transform_23(%arg0: i32) -> (i32, i32) {
    %c0_i32 = arith.constant 0 : i32
    %c0_i32_0 = arith.constant 0 : i32
    %c0_i32_1 = arith.constant 0 : i32
    return %c0_i32, %c0_i32_0 : i32, i32
  }
  func.func @transform_24(%arg0: i32) -> (i32, i32) {
    %c0_i32 = arith.constant 0 : i32
    %c0_i32_0 = arith.constant 0 : i32
    %c0_i32_1 = arith.constant 0 : i32
    return %c0_i32, %c0_i32_0 : i32, i32
  }
  func.func @transform_25(%arg0: i32) -> (i32, i32) {
    %c0_i32 = arith.constant 0 : i32
    %c0_i32_0 = arith.constant 0 : i32
    %c0_i32_1 = arith.constant 0 : i32
    return %c0_i32, %c0_i32_0 : i32, i32
  }
  func.func @transform_26(%arg0: i32) -> (i32, i32, i32) {
    %c0_i32 = arith.constant 0 : i32
    %c0_i32_0 = arith.constant 0 : i32
    %c0_i32_1 = arith.constant 0 : i32
    return %arg0, %c0_i32, %c0_i32_0 : i32, i32, i32
  }
}

</mosaic_0001>

<bundles_post_ra>
// kernel: _lambda_.1
= control target key start
LH: loop header
LB: loop body
LE: loop exit
PB: predicated region body
PF: predicated region fallthrough
CT: control target
= control target key end

     0   :  { %s6287_s0 = inlined_call_operand.vmem [shape: f32[2,16,32], index: 0, kind: input, shape index: {}]   ;;  %s6288_s1 = inlined_call_operand.vmem [shape: f32[2,16,32], index: 1, kind: input, shape index: {}]   ;;  %s6289_s2 = inlined_call_operand.vmem [shape: f32[2,16,32], index: 2, kind: input, shape index: {}]   ;;  %s6290_s3 = inlined_call_operand.vmem [shape: f32[2,16,32], index: 3, kind: input, shape index: {}]   ;;  %s6291_s4 = inlined_call_operand.vmem [shape: f32[16,4], index: 4, kind: input, shape index: {}]   ;;  %s6292_s5 = inlined_call_operand.vmem [shape: f32[32,64], index: 5, kind: input, shape index: {}]   ;;  %s6293_s6 = inlined_call_operand.vmem [shape: f32[1,64], index: 6, kind: input, shape index: {}]   ;;  %s6294_s7 = inlined_call_operand.vmem [shape: f32[32,32], index: 7, kind: input, shape index: {}]   ;;  %s6295_s8 = inlined_call_operand.vmem [shape: f32[1,32], index: 8, kind: input, shape index: {}, may-alias: {8,10,12,14,16,18}]   ;;  %s6296_s9 = inlined_call_operand.vmem [shape: f32[4,8,32], index: 9, kind: input, shape index: {}]   ;;  %s6297_s10 = inlined_call_operand.vmem [shape: f32[1,32], index: 10, kind: input, shape index: {}, may-alias: {8,10,12,14,16,18}]   ;;  %s6298_s11 = inlined_call_operand.vmem [shape: f32[32,32], index: 11, kind: input, shape index: {}]   ;;  %s6299_s12 = inlined_call_operand.vmem [shape: f32[1,32], index: 12, kind: input, shape index: {}, may-alias: {8,10,12,14,16,18}]   ;;  %s6300_s13 = inlined_call_operand.hbm [shape: f32[32,32], index: 13, kind: input, shape index: {}]   ;;  %s6301_s14 = inlined_call_operand.vmem [shape: f32[1,32], index: 14, kind: input, shape index: {}, may-alias: {8,10,12,14,16,18}]   ;;  %s6302_s15 = inlined_call_operand.hbm [shape: f32[32,32], index: 15, kind: input, shape index: {}]   ;;  %s6303_s16 = inlined_call_operand.vmem [shape: f32[1,32], index: 16, kind: input, shape index: {}, may-alias: {8,10,12,14,16,18}]   ;;  %s6304_s17 = inlined_call_operand.vmem [shape: f32[4,8,32], index: 17, kind: input, shape index: {}]   ;;  %s6305_s18 = inlined_call_operand.vmem [shape: f32[1,32], index: 18, kind: input, shape index: {}, may-alias: {8,10,12,14,16,18}]   ;;  %s6306_s19 = inlined_call_operand.hbm [shape: f32[6,32], index: 19, kind: input, shape index: {}]   ;;  %s6307_s20 = inlined_call_operand.hbm [shape: f32[9,32], index: 20, kind: input, shape index: {}]   ;;  %s6308_s21 = inlined_call_operand.vmem [shape: f32[32,64], index: 21, kind: input, shape index: {}]   ;;  %s6309_s22 = inlined_call_operand.vmem [shape: f32[1,64], index: 22, kind: input, shape index: {}]   ;;  %s6310_s23 = inlined_call_operand.hbm [shape: f32[9,64], index: 23, kind: input, shape index: {}]   ;;  %s6311_s24 = inlined_call_operand.vmem [shape: f32[64,32], index: 24, kind: input, shape index: {}]   ;;  %s6312_s25 = inlined_call_operand.vmem [shape: f32[1,32], index: 25, kind: input, shape index: {}]   ;;  %s6313_s26 = inlined_call_operand.vmem [shape: f32[2,16,32], index: 26, kind: output, shape index: {}]  }
   0x1   :  { %6322 = sst [smem:[#allocation14_spill]] %s6287_s0 }
   0x2   :  { %6323 = sst [smem:[#allocation15_spill]] %s6288_s1 }
   0x3   :  { %6324 = sst [smem:[#allocation16_spill]] %s6289_s2 }
   0x4   :  { %6325 = sst [smem:[#allocation17_spill]] %s6290_s3 }
   0x5   :  { %6326 = sst [smem:[#allocation18_spill]] %s6291_s4 }
   0x6   :  { %6327 = sst [smem:[#allocation19_spill]] %s6292_s5 }
   0x7   :  { %6328 = sst [smem:[#allocation20_spill]] %s6293_s6 }
   0x8   :  { %6329 = sst [smem:[#allocation21_spill]] %s6294_s7 }
   0x9   :  { %6330 = sst [smem:[#allocation22_spill]] %s6295_s8 }
   0xa   :  { %6331 = sst [smem:[#allocation23_spill]] %s6296_s9 }
   0xb   :  { %6332 = sst [smem:[#allocation24_spill]] %s6297_s10 }
   0xc   :  { %6333 = sst [smem:[#allocation25_spill]] %s6309_s22 }
   0xd   :  { %6334 = sst [smem:[#allocation26_spill]] %s6311_s24 }
   0xe   :  { %6335 = sst [smem:[#allocation27_spill]] %s6312_s25 }
   0xf   :  { %6336 = sst [smem:[#allocation28_spill]] %s6313_s26 }
  0x10   :  { %31 = vsyncpa [#allocation3], 0 }
  0x11   :  { %32 = vsyncpa [#allocation5], 0 }
  0x12   :  { %33 = vsyncpa [#allocation8], 0  ;;  %s5581_s27 = smov 0  }
  0x13 LB: > { %6337 = sst [smem:[#allocation13_spill]] %s5429_s27  ;;  %s5587_s3 = sadd.s32 4294967295, %s5429_s27   ;;  %s5429_s27 = sphi %s5581_s27, %s39_s27  }
  0x14   : > { %p4393_p0 = scmp.ge.s32.totalorder %s5429_s27, 1  ;;  %p636_p1 = scmp.lt.s32.totalorder %s5429_s27, 3 }
  0x15   : > { %p6320_p2 = scmp.eq.s32.totalorder %s5587_s3, 0  ;;  %s5431_s28 = smov [#allocation4]  }
  0x16   : > { %p5592_p3 = pnand %p4393_p0, %p636_p1  ;;  %s691_s8 = sshll.u32 %s5431_s28, 4  ;;  %s5596_s8 = int_to_ptr.vmem [resolvable:$true] %s691_s8 }
  0x17   : > { %s5432_s4 = smov [#allocation7]   ;;  %s5433_s9 = smov [#allocation2]  }
  0x18   : > { %s6338_s7 = scalar_select %p5592_p3, 1, 0 }
  0x19   : > { %p5059_p4 = pneg %p5592_p3  ;;  %s724_s29 = sshll.u32 %s5432_s4, 4  ;;  %s5600_s29 = int_to_ptr.vmem [resolvable:$true] %s724_s29 }
  0x1a   : > { %s675_s30 = sshll.u32 %s5433_s9, 4  ;;  %s5434_s2 = smov [#allocation6]   ;;  %s5608_s30 = int_to_ptr.vmem [resolvable:$true] %s675_s30 }
  0x1b   : > { %p5604_p5 = pnand %p6320_p2, %p5059_p4  ;;  %s5610_s5 = sshll.u32 %s5434_s2, 4  ;;  %s715_s5 = int_to_ptr.vmem [resolvable:$true] %s5610_s5 }
  0x1c   : > { %s5271_s1 = scalar_lea.hbm %s6302_s15, 512 }
  0x1d   : > { %p5272_p6 = scmp.ne.s32.totalorder %s6302_s15, %s5271_s1  ;;  %p5620_p7 = pneg %p5604_p5 }
  0x1e   : > { %p5278_p10 = scmp.lt.u32.totalorder %s5271_s1, %s6302_s15 }
  0x1f   : > { %p5274_p8 = pnand %p5620_p7, %p5272_p6 }
  0x21   : > { %p5275_p9 = pneg %p5274_p8 }
  0x23   : > { %p5280_p11 = pnand %p5278_p10, %p5275_p9 }
  0x25   : > { %5283 = shalt.err (!%p5280_p11)
}
  0x26   : > { %s5284_s10 = scalar_lea.vmem %s5596_s8, 512  ;;  %p5292_p1 = scmp.lt.s32.totalorder %s5596_s8, %s5596_s8 }
  0x27   : > { %p5285_p12 = scmp.ne.s32.totalorder %s5596_s8, %s5284_s10  ;;  %p5293_p4 = scmp.lt.s32.totalorder %s5284_s10, %s5284_s10 }
  0x29   : > { %p5287_p13 = pnand %p5285_p12, %p5620_p7  ;;  %p5294_p6 = por %p5293_p4, %p5292_p1 }
  0x2b   : > { %p5288_p0 = pneg %p5287_p13 }
  0x2d   : > { %p5295_p8 = pnand %p5294_p6, %p5288_p0 }
  0x2f   : > { %5298 = shalt.err (!%p5295_p8)
}
  0x30   : > { %s5435_s6 = smov 128   ;;  %s5436_s1 = smov 8  }
  0x31   : > { %5065 = dma.hbm_to_vmem [thread:$0]  (!%p5604_p5), %s6302_s15, 512, %s5596_s8, [#allocation5], %s5435_s6, %s5435_s6, %s5436_s1  }
  0x32   : > { %s5299_s10 = scalar_lea.hbm %s6307_s20, 256 }
  0x33   : > { %p5300_p9 = scmp.ne.s32.totalorder %s6307_s20, %s5299_s10  ;;  %p5306_p12 = scmp.lt.u32.totalorder %s5299_s10, %s6307_s20 }
  0x35   : > { %p5302_p10 = pnand %p5300_p9, %p5620_p7 }
  0x37   : > { %p5303_p11 = pneg %p5302_p10 }
  0x39   : > { %p5308_p13 = pnand %p5306_p12, %p5303_p11 }
  0x3b   : > { %5311 = shalt.err (!%p5308_p13)
}
  0x3c   : > { %s5312_s8 = scalar_lea.vmem %s5600_s29, 256  ;;  %p5320_p6 = scmp.lt.s32.totalorder %s5600_s29, %s5600_s29 }
  0x3d   : > { %p5313_p0 = scmp.ne.s32.totalorder %s5600_s29, %s5312_s8  ;;  %p5321_p8 = scmp.lt.s32.totalorder %s5312_s8, %s5312_s8 }
  0x3f   : > { %p5315_p1 = pnand %p5313_p0, %p5620_p7  ;;  %p5322_p9 = por %p5321_p8, %p5320_p6 }
  0x41   : > { %p5316_p4 = pneg %p5315_p1 }
  0x43   : > { %p5323_p10 = pnand %p5322_p9, %p5316_p4 }
  0x45   : > { %5326 = shalt.err (!%p5323_p10)
}
  0x46   : > { %5071 = dma.hbm_to_vmem [thread:$0]  (!%p5604_p5), %s6307_s20, 256, %s5600_s29, [#allocation8], %s5435_s6, %s5435_s6, %s5436_s1  }
  0x47   : > { %s5327_s28 = scalar_lea.hbm %s6300_s13, 512 }
  0x48   : > { %p5328_p11 = scmp.ne.s32.totalorder %s6300_s13, %s5327_s28  ;;  %p5334_p0 = scmp.lt.u32.totalorder %s5327_s28, %s6300_s13 }
  0x4a   : > { %p5330_p12 = pnand %p5328_p11, %p5620_p7 }
  0x4c   : > { %p5331_p13 = pneg %p5330_p12 }
  0x4e   : > { %p5336_p1 = pnand %p5334_p0, %p5331_p13 }
  0x50   : > { %5339 = shalt.err (!%p5336_p1)
}
  0x51   : > { %s5340_s29 = scalar_lea.vmem %s5608_s30, 512  ;;  %p5348_p9 = scmp.lt.s32.totalorder %s5608_s30, %s5608_s30 }
  0x52   : > { %p5341_p4 = scmp.ne.s32.totalorder %s5608_s30, %s5340_s29  ;;  %p5349_p10 = scmp.lt.s32.totalorder %s5340_s29, %s5340_s29 }
  0x54   : > { %p5343_p6 = pnand %p5341_p4, %p5620_p7  ;;  %p5350_p11 = por %p5349_p10, %p5348_p9 }
  0x56   : > { %p5344_p8 = pneg %p5343_p6 }
  0x58   : > { %p5351_p12 = pnand %p5350_p11, %p5344_p8 }
  0x5a   : > { %5354 = shalt.err (!%p5351_p12)
}
  0x5b   : > { %5062 = dma.hbm_to_vmem [thread:$0]  (!%p5604_p5), %s6300_s13, 512, %s5608_s30, [#allocation3], %s5435_s6, %s5435_s6, %s5436_s1  }
  0x5c   : > { %s5355_s26 = scalar_lea.hbm %s6306_s19, 128 }
  0x5d   : > { %p5356_p13 = scmp.ne.s32.totalorder %s6306_s19, %s5355_s26  ;;  %p5362_p4 = scmp.lt.u32.totalorder %s5355_s26, %s6306_s19 }
  0x5f   : > { %p5358_p0 = pnand %p5356_p13, %p5620_p7 }
  0x61   : > { %p5359_p1 = pneg %p5358_p0 }
  0x63   : > { %p5364_p6 = pnand %p5362_p4, %p5359_p1 }
  0x65   : > { %5367 = shalt.err (!%p5364_p6)
}
  0x66   : > { %s5368_s10 = scalar_lea.vmem %s715_s5, 128  ;;  %p5376_p11 = scmp.lt.s32.totalorder %s715_s5, %s715_s5 }
  0x67   : > { %p5369_p8 = scmp.ne.s32.totalorder %s715_s5, %s5368_s10  ;;  %p5377_p12 = scmp.lt.s32.totalorder %s5368_s10, %s5368_s10 }
  0x69   : > { %p5371_p9 = pnand %p5369_p8, %p5620_p7  ;;  %p5378_p2 = por %p5377_p12, %p5376_p11 }
  0x6b   : > { %p5372_p10 = pneg %p5371_p9 }
  0x6d   : > { %p5379_p3 = pnand %p5378_p2, %p5372_p10 }
  0x6f   : > { %5382 = shalt.err (!%p5379_p3)
}
  0x70   : > { %5068 = dma.hbm_to_vmem [thread:$0]  (!%p5604_p5), %s6306_s19, 128, %s715_s5, [#allocation5]  }
  0x71   : > { %s5437_s8 = smov [#allocation9]   ;;  %s5383_s26 = scalar_lea.hbm %s6310_s23, 256 }
  0x72   : > { %s743_s22 = sshll.u32 %s5437_s8, 4  ;;  %p5384_p13 = scmp.ne.s32.totalorder %s6310_s23, %s5383_s26  ;;  %s744_s22 = int_to_ptr.vmem [resolvable:$true] %s743_s22 }
  0x73   : > { %p5390_p0 = scmp.lt.u32.totalorder %s5383_s26, %s6310_s23 }
  0x74   : > { %p5386_p2 = pnand %p5384_p13, %p5620_p7 }
  0x76   : > { %p5387_p3 = pneg %p5386_p2 }
  0x78   : > { %p5392_p1 = pnand %p5390_p0, %p5387_p3 }
  0x7a   : > { %5395 = shalt.err (!%p5392_p1)
}
  0x7b   : > { %s5396_s5 = scalar_lea.vmem %s744_s22, 256  ;;  %p5404_p9 = scmp.lt.s32.totalorder %s744_s22, %s744_s22 }
  0x7c   : > { %p5397_p4 = scmp.ne.s32.totalorder %s744_s22, %s5396_s5  ;;  %p5405_p10 = scmp.lt.s32.totalorder %s5396_s5, %s5396_s5 }
  0x7e   : > { %p5399_p6 = pnand %p5397_p4, %p5620_p7  ;;  %p5406_p11 = por %p5405_p10, %p5404_p9 }
  0x80   : > { %p5400_p8 = pneg %p5399_p6 }
  0x82   : > { %p5407_p12 = pnand %p5406_p11, %p5400_p8 }
  0x84   : > { %5410 = shalt.err (!%p5407_p12)
}
  0x85   : > { %5074 = dma.hbm_to_vmem [thread:$0]  (!%p5604_p5), %s6310_s23, 256, %s744_s22, [#allocation8], %s5435_s6, %s5435_s6, %s5436_s1  }
  0x86   : > { %p6341_p13 = scmp.ne.s32.totalorder %s6338_s7, 0 }
  0x87   : > { %p6342_p7 = scmp.eq.s32.totalorder (!%p6341_p13), %s5587_s3, 0 }
  0x88   : > { %797 = sbr.rel (%p6341_p13) target bundleno = 3941 (0xf65), region = 124 }
  0x8f   : > { %5416 = dma.done.wait (%p6342_p7), [#allocation3], 512   ;;  %p6343_p2 = pmov %p6342_p7 }
  0x91   : > { %5418 = vsyncadd (%p6343_p2), [#allocation3], 4294966784  ;;  %p6344_p3 = pmov %p6343_p2 }
  0x92   : > { %p6345_p0 = pmov %p6343_p2 }
  0x93   : > { %5420 = dma.done.wait (%p6344_p3), [#allocation5], 640  }
  0x94   : > { %5422 = vsyncadd (%p6345_p0), [#allocation5], 4294966656  ;;  %p6346_p1 = pmov %p6345_p0 }
  0x95   : > { %p6347_p5 = pmov %p6345_p0 }
  0x96   : > { %5424 = dma.done.wait (%p6346_p1), [#allocation8], 512  }
  0x97   : > { %5426 = vsyncadd (%p6347_p5), [#allocation8], 4294966784  ;;  %p898_p4 = scmp.lt.s32.totalorder %s5587_s3, 1  ;;  %s6348_s6 = sld [smem:[#allocation14_spill]]  ;;  %vm945_vm0 = vcmask 261120   ;;  %vm1173_vm1 = vcmask 64512  }
  0x98   : > { %s6349_s22 = sld [smem:[#allocation15_spill]]  ;;  %s6350_s28 = sld [smem:[#allocation19_spill]]  ;;  %vm5815_vm2 = vmpackc.low %vm1173_vm1, %vm1173_vm1  ;;  %vm1518_vm3 = vcmask 130048   ;;  %vm4122_vm7 = vcmask 523264  }
  0x99   : > { %s6367_s3 = smov (!%p898_p4, %s5587_s3), 1  ;;  %s6351_s0 = sld [smem:[#allocation20_spill]] }
  0x9a   : > { %s5752_s27 = sshll.u32 %s6367_s3, 4  ;;  %s5440_s29 = smov 96  }
  0x9b   : > { %s5441_s8 = smov 112   ;;  %s6352_s25 = sld [smem:[#allocation21_spill]] }
  0x9c   : > { %s6355_s7 = sld [smem:[#allocation22_spill]]  ;;  %s6357_s30 = sld [smem:[#allocation24_spill]] }
  0x9d   : > { %s902_s1 = scalar_lea.vmem %s6348_s6, %s5752_s27  ;;  %s5438_s6 = smov 104  }
  0x9e   : > { %s907_s24 = scalar_lea.vmem %s6349_s22, %s5752_s27  ;;  %v934_v0 = vld [vmem:[%s6350_s28] sm:$0xff]  ;;  %v935_v1 = vld [vmem:[%s6350_s28 + $0x8] sm:$0xff]  ;;  %v936_v2 = vld [vmem:[%s6350_s28 + $0x10] sm:$0xff]  ;;  %s6356_s22 = sld [smem:[#allocation23_spill]] }
  0x9f   : > { %v4883_v3 = vpack.c.bf16 %v935_v1, %v934_v0  ;;  %v937_v4 = vld [vmem:[%s6350_s28 + $0x18] sm:$0xff]  ;;  %v5774_v5 = vld [vmem:[%s902_s1] sm:$0xff]  ;;  %v5782_v9 = vld [vmem:[%s902_s1 + $0x8] sm:$0xff]  ;;  %s5439_s1 = smov 120   ;;  %s6358_s10 = sld [smem:[#allocation16_spill]] }
  0xa0   : > { %v4887_v6 = vpack.c.bf16 %v937_v4, %v936_v2  ;;  %v5776_v7 = vld [vmem:[%s907_s24] sm:$0xff]  ;;  %4665 = vmatprep.mubr.msk.f32.mxu1 %vm945_vm0, %v5774_v5  ;;  %v5784_v10 = vld [vmem:[%s907_s24 + $0x8] sm:$0xff]  ;;  %s6361_s9 = sld [smem:[#allocation26_spill]] }
  0xa1   : > { %4884 = vmatprep.subr.bf16.mxu0 %v4883_v3  ;;  %v932_v8 = vadd.f32 %v5776_v7, %v5774_v5  ;;  %v933_v11 = vadd.f32 %v5784_v10, %v5782_v9  ;;  %v4416_v12 = vld [vmem:[%s6351_s0] ss:$0 sm:$0xff]  ;;  %v1028_v20 = vld [vmem:[%s6352_s25 + $0x8] sm:$0xff]  ;;  %v1029_v21 = vld [vmem:[%s6352_s25 + $0x10] sm:$0xff]  ;;  %s6364_s0 = sld [smem:[#allocation28_spill]] }
  0xa2   : > { %4886 = vmatpush3.bf16.msra.mxu0 %v4883_v3  ;;  %v1027_v19 = vld [vmem:[%s6352_s25] sm:$0xff]  ;;  %v1030_v23 = vld [vmem:[%s6352_s25 + $0x18] sm:$0xff] }
  0xa3   : > { %4888 = vmatprep.subr.bf16.mxu0 %v4887_v6  ;;  %4654 = vmatprep.mubr.msk.f32.mxu0 %vm945_vm0, %v932_v8  ;;  %v4891_v22 = vpack.c.bf16 %v1028_v20, %v1027_v19  ;;  %v4895_v24 = vpack.c.bf16 %v1030_v23, %v1029_v21  ;;  %v4419_v37 = vld [vmem:[%s6355_s7] ss:$0 sm:$0xff] }
  0xa5   : > { %4892 = vmatprep.subr.bf16.mxu1 %v4891_v22 }
  0xa6   : > { %4890 = vmatpush3.bf16.msra.mxu0 %v4887_v6  ;;  %4894 = vmatpush3.bf16.msra.mxu1 %v4891_v22 }
  0xa7   : > { %4896 = vmatprep.subr.bf16.mxu1 %v4895_v24 }
  0xa9   : > { %4655 = vmatmul.mubr.msk.f32.vlgmr.msra.gmra.mrb[0].mxu0 %vm945_vm0, %v933_v11 }
  0xaa   : > { %4898 = vmatpush3.bf16.msra.mxu1 %v4895_v24 }
  0xad   : > { %4666 = vmatmul.mubr.msk.f32.vlgmr.msra.gmra.mrb[0].mxu1 %vm945_vm0, %v5782_v9 }
 0x17c   : > { %v4656_v13 = vpop.f32.mrb[0].mxu0 }
 0x17d   : > { %v1024_v14 = vadd.f32 %v4656_v13, %v4416_v12  ;;  %v1018_v15 = vpop.f32.mrb[1].mxu0 }
 0x17e   : > { %v1019_v16 = vadd.f32 %v4416_v12, %v1018_v15 }
 0x17f   : > { %v1120_v33 = vmul.f32 0.35355338, %v1024_v14 }
 0x180   : > { %v5118_v17 = vpack.i.bf16 %v1024_v14, %v1019_v16  ;;  %v1119_v18 = vmul.f32 0.35355338, %v1019_v16  ;;  %v4667_v34 = vpop.f32.mrb[0].mxu1 }
 0x181   : > { %v1110_v35 = vpop.f32.mrb[1].mxu1  ;;  %v5835_v41 = vadd.f32 %v4667_v34, %v4419_v37 }
 0x182   : > { %5119 = vrot.lane.b32.xlu1 %v5118_v17, %s5438_s6  ;;  %5109 = vrot.lane.b32.xlu0 %v5118_v17, %s5439_s1  ;;  %v5837_v42 = vadd.f32 %v4419_v37, %v1110_v35 }
 0x183   : > { %4672 = vmatprep.mubr.msk.f32.mxu0 %vm1173_vm1, %v1119_v18 }
 0x184   : > { %v4923_v48 = vpack.c.bf16 %v5835_v41, %v5837_v42 }
 0x186   : > { %5124 = vrot.lane.b32.xlu1 %v5118_v17, %s5440_s29  ;;  %5114 = vrot.lane.b32.xlu0 %v5118_v17, %s5441_s8 }
 0x1f4   : > { %v5120_v25 = vpop.permute.xlu1 %5119  ;;  %v5110_v26 = vpop.permute.xlu0 %5109 }
 0x1f5   : > { %5129 = vrot.lane.b32.xlu0 %v5110_v26, %s5440_s29 }
 0x1f8   : > { %v5125_v27 = vpop.permute.xlu1 %5124  ;;  %v5115_v28 = vpop.permute.xlu0 %5114 }
 0x1f9   : > { %v5127_v29 = vunpack.i.h.bf16 %v5125_v27  ;;  %v5126_v30 = vunpack.i.l.bf16 %v5125_v27  ;;  %5134 = vrot.lane.b32.xlu1 %v5115_v28, %s5440_s29  ;;  %1123 = vrot.lane.b32.xlu0 %v1119_v18, %s5439_s1 }
 0x1fb   : > { %v4899_v32 = vpack.c.bf16 %v5127_v29, %v5126_v30 }
 0x1fd   : > { %4901 = vmatprep.subr.msk.bf16.mxu0 %vm5815_vm2, %v4899_v32  ;;  %1125 = vrot.lane.b32.xlu1 %v1120_v33, %s5439_s1 }
 0x1fe   : > { %4904 = vmatpush3.bf16.xpose.msk.msra.mxu0 %vm5815_vm2, %v4899_v32  ;;  %5139 = vrot.lane.b32.xlu0 %v5120_v25, %s5440_s29  ;;  %s6359_s29 = sld [smem:[#allocation17_spill]] }
 0x201   : > { %1127 = vrot.lane.b32.xlu1 %v1119_v18, %s5441_s8 }
 0x202   : > { %1129 = vrot.lane.b32.xlu0 %v1120_v33, %s5441_s8 }
 0x204   : > { %s917_s24 = scalar_lea.vmem %s6359_s29, %s5752_s27  ;;  %s922_s29 = scalar_lea.vmem %s6364_s0, %s5752_s27 }
 0x205   : > { %4673 = vmatmul.mubr.msk.f32.vlgmr.msra.gmra.mrb[2].mxu0 %vm1173_vm1, %v1120_v33  ;;  %1131 = vrot.lane.b32.xlu1 %v1119_v18, %s5438_s6 }
 0x206   : > { %1133 = vrot.lane.b32.xlu0 %v1120_v33, %s5438_s6 }
 0x267   : > { %v5130_v36 = vpop.permute.xlu0 %5129 }
 0x268   : > { %v5132_v38 = vunpack.i.h.bf16 %v5130_v36  ;;  %v5131_v39 = vunpack.i.l.bf16 %v5130_v36 }
 0x26a   : > { %v4905_v40 = vpack.c.bf16 %v5132_v38, %v5131_v39 }
 0x26b   : > { %v5135_v43 = vpop.permute.xlu1 %5134  ;;  %v1124_v46 = vpop.permute.xlu0 %1123 }
 0x26c   : > { %v5137_v44 = vunpack.i.h.bf16 %v5135_v43  ;;  %v5136_v45 = vunpack.i.l.bf16 %v5135_v43  ;;  %4907 = vmatprep.subr.msk.bf16.mxu1 %vm5815_vm2, %v4905_v40  ;;  %4679 = vmatprep.mubr.msk.f32.mxu1 %vm1173_vm1, %v1124_v46 }
 0x26d   : > { %4910 = vmatpush3.bf16.xpose.msk.msra.mxu1 %vm5815_vm2, %v4905_v40 }
 0x26e   : > { %v4911_v47 = vpack.c.bf16 %v5137_v44, %v5136_v45 }
 0x26f   : > { %v1126_v49 = vpop.permute.xlu1 %1125 }
 0x270   : > { %v5140_v50 = vpop.permute.xlu0 %5139  ;;  %4913 = vmatprep.subr.msk.bf16.mxu0 %vm5815_vm2, %v4911_v47 }
 0x271   : > { %v5142_v51 = vunpack.i.h.bf16 %v5140_v50  ;;  %v5141_v52 = vunpack.i.l.bf16 %v5140_v50  ;;  %4916 = vmatpush3.bf16.xpose.msk.msra.mxu0 %vm5815_vm2, %v4911_v47 }
 0x272   : > { %4924 = vmatprep.subr.bf16.mxu0 %v4923_v48 }
 0x273   : > { %v4917_v53 = vpack.c.bf16 %v5142_v51, %v5141_v52  ;;  %v1128_v54 = vpop.permute.xlu1 %1127 }
 0x274   : > { %4680 = vmatmul.mubr.msk.f32.vlgmr.msra.gmra.mrb[2].mxu1 %vm1173_vm1, %v1126_v49  ;;  %4686 = vmatprep.mubr.msk.f32.mxu0 %vm1173_vm1, %v1128_v54  ;;  %v1130_v55 = vpop.permute.xlu0 %1129 }
 0x275   : > { %4919 = vmatprep.subr.msk.bf16.mxu1 %vm5815_vm2, %v4917_v53 }
 0x276   : > { %4922 = vmatpush3.bf16.xpose.msk.msra.mxu1 %vm5815_vm2, %v4917_v53 }
 0x277   : > { %v1132_v56 = vpop.permute.xlu1 %1131 }
 0x278   : > { %4687 = vmatmul.mubr.msk.f32.vlgmr.msra.gmra.mrb[4].mxu0 %vm1173_vm1, %v1130_v55  ;;  %4693 = vmatprep.mubr.msk.f32.mxu1 %vm1173_vm1, %v1132_v56  ;;  %v1134_v57 = vpop.permute.xlu0 %1133 }
 0x279   : > { %4926 = vmatpush3.bf16.msra.mxu0 %v4923_v48 }
 0x27d   : > { %4694 = vmatmul.mubr.msk.f32.vlgmr.msra.gmra.mrb[4].mxu1 %vm1173_vm1, %v1134_v57  ;;  %v5148_v57 = vpack.i.bf16 %v5835_v41, %v5837_v42 }
 0x2d8   : > { %v4674_v58 = vpop.f32.mrb[2].mxu0 }
 0x2d9   : > { %v1248_v59 = vpop.f32.mrb[3].mxu0  ;;  %v1522_v60 = vsel %vm1518_vm3, %v4674_v58, -inf }
 0x2da   : > { %1523 = vmax.xlane.f32.xlu0 %v1522_v60  ;;  %v1519_v61 = vsel %vm1518_vm3, %v1248_v59, -inf }
 0x2db   : > { %1520 = vmax.xlane.f32.xlu1 %v1519_v61 }
 0x347   : > { %v4681_v62 = vpop.f32.mrb[2].mxu1 }
 0x348   : > { %v1335_v63 = vpop.f32.mrb[3].mxu1  ;;  %v1528_v0 = vsel %vm1518_vm3, %v4681_v62, -inf }
 0x349   : > { %1529 = vmax.xlane.f32.xlu1 %v1528_v0  ;;  %v1525_v1 = vsel %vm1518_vm3, %v1335_v63, -inf }
 0x34a   : > { %1526 = vmax.xlane.f32.xlu0 %v1525_v1 }
 0x34b   : > { %v4688_v2 = vpop.f32.mrb[4].mxu0 }
 0x34c   : > { %v1422_v3 = vpop.f32.mrb[5].mxu0  ;;  %v1534_v4 = vsel %vm1518_vm3, %v4688_v2, -inf }
 0x34d   : > { %1535 = vmax.xlane.f32.xlu1 %v1534_v4  ;;  %v1531_v6 = vsel %vm1518_vm3, %v1422_v3, -inf }
 0x34e   : > { %1532 = vmax.xlane.f32.xlu0 %v1531_v6 }
 0x350   : > { %v4695_v8 = vpop.f32.mrb[4].mxu1 }
 0x351   : > { %v1509_v11 = vpop.f32.mrb[5].mxu1  ;;  %v1540_v12 = vsel %vm1518_vm3, %v4695_v8, -inf }
 0x352   : > { %1541 = vmax.xlane.f32.xlu1 %v1540_v12  ;;  %v1537_v13 = vsel %vm1518_vm3, %v1509_v11, -inf }
 0x353   : > { %1538 = vmax.xlane.f32.xlu0 %v1537_v13 }
 0x367   : > { %v1524_v14 = vpop.xlane.xlu0 %1523 }
 0x368   : > { %v1544_v15 = vsub.f32 %v4674_v58, %v1524_v14  ;;  %v1521_v16 = vpop.xlane.xlu1 %1520 }
 0x369   : > { %v1543_v17 = vsub.f32 %v1248_v59, %v1521_v16 }
 0x36a   : > { %v1553_v18 = vmul.f32 1.442695, %v1544_v15 }
 0x36b   : > { %v1551_v19 = vmul.f32 1.442695, %v1543_v17 }
 0x36c   : > { %5194 = vpow2.f32 %v1553_v18 }
 0x36d   : > { %5196 = vpow2.f32 %v1551_v19 }
 0x376   : > { %v5195_v20 = vpop.eup %5194 }
 0x377   : > { %v5197_v21 = vpop.eup %5196  ;;  %v1570_v22 = vsel %vm1518_vm3, %v5195_v20, 0.0 }
 0x378   : > { %1571 = vadd.xlane.f32.xlu1 %v1570_v22  ;;  %v1567_v23 = vsel %vm1518_vm3, %v5197_v21, 0.0 }
 0x379   : > { %1568 = vadd.xlane.f32.xlu0 %v1567_v23 }
 0x3d6   : > { %v1530_v24 = vpop.xlane.xlu1 %1529 }
 0x3d7   : > { %v1546_v25 = vsub.f32 %v4681_v62, %v1530_v24  ;;  %v1527_v26 = vpop.xlane.xlu0 %1526 }
 0x3d8   : > { %v1545_v27 = vsub.f32 %v1335_v63, %v1527_v26 }
 0x3d9   : > { %v1557_v28 = vmul.f32 1.442695, %v1546_v25 }
 0x3da   : > { %v1555_v29 = vmul.f32 1.442695, %v1545_v27  ;;  %v1536_v30 = vpop.xlane.xlu1 %1535 }
 0x3db   : > { %5198 = vpow2.f32 %v1557_v28  ;;  %v1548_v32 = vsub.f32 %v4688_v2, %v1536_v30  ;;  %v1533_v33 = vpop.xlane.xlu0 %1532  ;;  %v1931_v30 = vld [vmem:[%s6356_s22] sm:$0xff] }
 0x3dc   : > { %5200 = vpow2.f32 %v1555_v29  ;;  %v1547_v34 = vsub.f32 %v1422_v3, %v1533_v33 }
 0x3dd   : > { %v1561_v35 = vmul.f32 1.442695, %v1548_v32 }
 0x3de   : > { %v1559_v36 = vmul.f32 1.442695, %v1547_v34  ;;  %v1932_v34 = vld [vmem:[%s6356_s22 + $0x8] sm:$0xff] }
 0x3df   : > { %5202 = vpow2.f32 %v1561_v35  ;;  %v1542_v37 = vpop.xlane.xlu1 %1541 }
 0x3e0   : > { %5204 = vpow2.f32 %v1559_v36  ;;  %v1550_v38 = vsub.f32 %v4695_v8, %v1542_v37  ;;  %v1539_v39 = vpop.xlane.xlu0 %1538  ;;  %v1933_v37 = vld [vmem:[%s6356_s22 + $0x10] sm:$0xff] }
 0x3e1   : > { %v1549_v40 = vsub.f32 %v1509_v11, %v1539_v39 }
 0x3e2   : > { %v1565_v43 = vmul.f32 1.442695, %v1550_v38 }
 0x3e3   : > { %v1563_v44 = vmul.f32 1.442695, %v1549_v40  ;;  %v1934_v40 = vld [vmem:[%s6356_s22 + $0x18] sm:$0xff] }
 0x3e4   : > { %5206 = vpow2.f32 %v1565_v43 }
 0x3e5   : > { %v5869_v45 = vpop.eup %5198  ;;  %5208 = vpow2.f32 %v1563_v44 }
 0x3e6   : > { %v5201_v46 = vpop.eup %5200  ;;  %v1576_v47 = vsel %vm1518_vm3, %v5869_v45, 0.0 }
 0x3e7   : > { %1577 = vadd.xlane.f32.xlu1 %v1576_v47  ;;  %v1573_v48 = vsel %vm1518_vm3, %v5201_v46, 0.0  ;;  %v4454_v47 = vld [vmem:[%s6357_s30] ss:$0 sm:$0xff]  ;;  %s5941_s30 = scalar_lea.vmem %s6358_s10, %s5752_s27  ;;  %s6363_s10 = sld [smem:[#allocation27_spill]] }
 0x3e8   : > { %1574 = vadd.xlane.f32.xlu0 %v1573_v48 }
 0x3e9   : > { %v5874_v49 = vpop.eup %5202 }
 0x3ea   : > { %v5205_v50 = vpop.eup %5204  ;;  %v1582_v51 = vsel %vm1518_vm3, %v5874_v49, 0.0 }
 0x3eb   : > { %1583 = vadd.xlane.f32.xlu1 %v1582_v51  ;;  %v1579_v52 = vsel %vm1518_vm3, %v5205_v50, 0.0 }
 0x3ec   : > { %1580 = vadd.xlane.f32.xlu0 %v1579_v52 }
 0x3ee   : > { %v5207_v53 = vpop.eup %5206 }
 0x3ef   : > { %v5209_v54 = vpop.eup %5208  ;;  %v1588_v55 = vsel %vm1518_vm3, %v5207_v53, 0.0 }
 0x3f0   : > { %1589 = vadd.xlane.f32.xlu1 %v1588_v55  ;;  %v1585_v56 = vsel %vm1518_vm3, %v5209_v54, 0.0 }
 0x3f1   : > { %1586 = vadd.xlane.f32.xlu0 %v1585_v56 }
 0x401   : > { %5149 = vrot.lane.b32.xlu1 %v5148_v57, %s5441_s8 }
 0x405   : > { %v1572_v58 = vpop.xlane.xlu1 %1571  ;;  %5154 = vrot.lane.b32.xlu1 %v5148_v57, %s5438_s6 }
 0x406   : > { %5210 = vrcp.f32 %v1572_v58  ;;  %v1569_v59 = vpop.xlane.xlu0 %1568 }
 0x407   : > { %5212 = vrcp.f32 %v1569_v59  ;;  %5144 = vrot.lane.b32.xlu0 %v5148_v57, %s5439_s1 }
 0x410   : > { %v5211_v60 = vpop.eup %5210 }
 0x411   : > { %v5213_v61 = vpop.eup %5212  ;;  %v1600_v63 = vmul.f32 %v5211_v60, %v5195_v20 }
 0x412   : > { %v1599_v62 = vmul.f32 %v5213_v61, %v5197_v21  ;;  %v2323_v61 = vld [vmem:[%s6298_s11 + $0x10] sm:$0xff] }
 0x414   : > { %4700 = vmatprep.mubr.msk.f32.mxu0 %vm1518_vm3, %v1599_v62  ;;  %v2324_v62 = vld [vmem:[%s6298_s11 + $0x18] sm:$0xff] }
 0x415   : > { %4701 = vmatmul.mubr.msk.f32.vlgmr.msra.gmra.mrb[6].mxu0 %vm1518_vm3, %v1600_v63  ;;  %v4943_v63 = vpack.c.bf16 %v2324_v62, %v2323_v61 }
 0x474   : > { %v1578_v0 = vpop.xlane.xlu1 %1577 }
 0x475   : > { %v1575_v41 = vpop.xlane.xlu0 %1574 }
 0x476   : > { %5214 = vrcp.f32 %v1575_v41  ;;  %v2416_v41 = vld [vmem:[#allocation2 + $0x8] sm:$0xff] }
 0x477   : > { %5216 = vrcp.f32 %v1578_v0  ;;  %v2415_v0 = vld [vmem:[#allocation2] sm:$0xff] }
 0x478   : > { %v1584_v42 = vpop.xlane.xlu1 %1583 }
 0x479   : > { %v1581_v1 = vpop.xlane.xlu0 %1580 }
 0x47a   : > { %5218 = vrcp.f32 %v1581_v1  ;;  %v927_v1 = vld [vmem:[%s5941_s30] sm:$0xff] }
 0x47d   : > { %v1590_v2 = vpop.xlane.xlu1 %1589 }
 0x47e   : > { %5220 = vrcp.f32 %v1590_v2  ;;  %v1587_v3 = vpop.xlane.xlu0 %1586 }
 0x47f   : > { %5222 = vrcp.f32 %v1587_v3 }
 0x480   : > { %v5215_v4 = vpop.eup %5214  ;;  %5224 = vrcp.f32 %v1584_v42  ;;  %v4947_v42 = vpack.c.bf16 %v2416_v41, %v2415_v0 }
 0x481   : > { %v5150_v6 = vpop.permute.xlu1 %5149  ;;  %v1601_v8 = vmul.f32 %v5215_v4, %v5201_v46  ;;  %v5217_v18 = vpop.eup %5216 }
 0x482   : > { %v5145_v11 = vpop.permute.xlu0 %5144  ;;  %v5152_v12 = vunpack.i.h.bf16 %v5150_v6  ;;  %v5151_v13 = vunpack.i.l.bf16 %v5150_v6  ;;  %v1602_v26 = vmul.f32 %v5217_v18, %v5869_v45 }
 0x483   : > { %v5147_v14 = vunpack.i.h.bf16 %v5145_v11  ;;  %v5146_v15 = vunpack.i.l.bf16 %v5145_v11  ;;  %4707 = vmatprep.mubr.msk.f32.mxu0 %vm1518_vm3, %v1601_v8 }
 0x484   : > { %v5219_v21 = vpop.eup %5218  ;;  %v4931_v22 = vpack.c.bf16 %v5152_v12, %v5151_v13 }
 0x485   : > { %v4927_v16 = vpack.c.bf16 %v5147_v14, %v5146_v15  ;;  %v5155_v17 = vpop.permute.xlu1 %5154  ;;  %v1603_v28 = vmul.f32 %v5219_v21, %v5205_v50  ;;  %v2307_v15 = vlaneseq }
 0x486   : > { %v5157_v19 = vunpack.i.h.bf16 %v5155_v17  ;;  %v5156_v20 = vunpack.i.l.bf16 %v5155_v17 }
 0x487   : > { %4928 = vmatprep.subr.bf16.mxu0 %v4927_v16 }
 0x488   : > { %v5221_v23 = vpop.eup %5220  ;;  %v4935_v24 = vpack.c.bf16 %v5157_v19, %v5156_v20  ;;  %4930 = vmatpush3.bf16.msra.mxu0 %v4927_v16  ;;  %v5945_v20 = vshrl.u32 %v2307_v15, 7 }
 0x489   : > { %v5223_v25 = vpop.eup %5222  ;;  %4932 = vmatprep.subr.bf16.mxu0 %v4931_v22  ;;  %v1606_v32 = vmul.f32 %v5221_v23, %v5207_v53  ;;  %v5950_v23 = vld [vmem:[#allocation6] sm:$0x3f] }
 0x48a   : > { %v5225_v27 = vpop.eup %5224  ;;  %4936 = vmatprep.subr.bf16.mxu1 %v4935_v24  ;;  %v1605_v29 = vmul.f32 %v5223_v25, %v5209_v54  ;;  %vm3815_vm4 = vcmp.lt.s32.totalorder %v5945_v20, 7  ;;  %vm3810_vm5 = vcmp.lt.s32.totalorder %v5945_v20, 1  ;;  %vm3864_vm6 = vcmp.lt.s32.totalorder %v5945_v20, 4 }
 0x48b   : > { %4708 = vmatmul.mubr.msk.f32.vlgmr.msra.gmra.mrb[8].mxu0 %vm1518_vm3, %v1602_v26  ;;  %4938 = vmatpush3.bf16.msra.mxu1 %v4935_v24  ;;  %v1604_v33 = vmul.f32 %v5225_v27, %v5874_v49  ;;  %v5953_v24 = vsub.s32 3, %v5945_v20 }
 0x48c   : > { %4934 = vmatpush3.bf16.msra.mxu0 %v4931_v22  ;;  %4714 = vmatprep.mubr.msk.f32.mxu0 %vm1518_vm3, %v1603_v28  ;;  %v5948_v22 = vsub.s32 0, %v5945_v20 }
 0x48d   : > { %4721 = vmatprep.mubr.msk.f32.mxu1 %vm1518_vm3, %v1605_v29  ;;  %4724 = vmatprep.subr.mxu0 %v1931_v30  ;;  %v2316_v29 = vrot.slane %v5950_v23, %v5953_v24 }
 0x48e   : > { %4722 = vmatmul.mubr.msk.f32.vlgmr.msra.gmra.mrb[6].mxu1 %vm1518_vm3, %v1606_v32  ;;  %v2310_v26 = vrot.slane %v5950_v23, %v5948_v22 }
 0x48f   : > { %4715 = vmatmul.mubr.msk.f32.vlgmr.msra.gmra.mrb[10].mxu0 %vm1518_vm3, %v1604_v33 }
 0x490   : > { %4725 = vmatpush3.msra.mxu0 %v1931_v30 }
 0x491   : > { %4729 = vmatprep.subr.mxu0 %v1932_v34 }
 0x4e8   : > { %v4702_v35 = vpop.f32.mrb[6].mxu0 }
 0x4e9   : > { %v1679_v36 = vpop.f32.mrb[7].mxu0 }
 0x4ea   : > { %4726 = vmatprep.mubr.msk.f32.mxu0 %vm1173_vm1, %v1679_v36 }
 0x4eb   : > { %4727 = vmatmul.mubr.msk.f32.vlgmr.msra.gmra.mrb[12].mxu0 %vm1173_vm1, %v4702_v35 }
 0x4ec   : > { %4730 = vmatpush3.msra.mxu0 %v1932_v34 }
 0x4ed   : > { %4734 = vmatprep.subr.mxu0 %v1933_v37 }
 0x55e   : > { %v4709_v38 = vpop.f32.mrb[8].mxu0 }
 0x55f   : > { %v1760_v39 = vpop.f32.mrb[9].mxu0 }
 0x560   : > { %4731 = vmatprep.mubr.msk.f32.mxu0 %vm1173_vm1, %v1760_v39  ;;  %v2417_v39 = vld [vmem:[#allocation2 + $0x10] sm:$0xff] }
 0x561   : > { %v4723_v43 = vpop.f32.mrb[6].mxu1  ;;  %4732 = vmatmul.mubr.msk.f32.vlgmr.msra.gmra.mrb[12].mxu0 %vm1173_vm1, %v4709_v38  ;;  %v929_v38 = vld [vmem:[%s917_s24] sm:$0xff] }
 0x562   : > { %v4716_v44 = vpop.f32.mrb[10].mxu0  ;;  %v1922_v45 = vpop.f32.mrb[7].mxu1  ;;  %4735 = vmatpush3.msra.mxu0 %v1933_v37 }
 0x563   : > { %v1841_v46 = vpop.f32.mrb[11].mxu0  ;;  %4739 = vmatprep.subr.mxu0 %v1934_v40 }
 0x564   : > { %4736 = vmatprep.mubr.msk.f32.mxu0 %vm1173_vm1, %v1841_v46 }
 0x569   : > { %4737 = vmatmul.mubr.msk.f32.vlgmr.msra.gmra.mrb[12].mxu0 %vm1173_vm1, %v4716_v44  ;;  %v2413_v44 = vadd.f32 %v929_v38, %v927_v1 }
 0x56a   : > { %4740 = vmatpush3.msra.mxu0 %v1934_v40  ;;  %4741 = vmatprep.mubr.msk.f32.mxu0 %vm1173_vm1, %v1922_v45  ;;  %v2418_v40 = vld [vmem:[#allocation2 + $0x18] sm:$0xff] }
 0x56b   : > { %v4951_v46 = vpack.c.bf16 %v2418_v40, %v2417_v39 }
 0x571   : > { %4742 = vmatmul.mubr.msk.f32.vlgmr.msra.gmra.mrb[12].mxu0 %vm1173_vm1, %v4723_v43 }
 0x572   : > { %4774 = vmatprep.mubr.msk.f32.mxu0 %vm945_vm0, %v927_v1  ;;  %v4461_v1 = vld [vmem:[%s6303_s16] ss:$0 sm:$0xff] }
 0x644   : > { %v4743_v48 = vpop.f32.mrb[12].mxu0 }
 0x645   : > { %v2273_v49 = vadd.f32 %v4743_v48, %v4454_v47  ;;  %v2250_v50 = vpop.f32.mrb[13].mxu0  ;;  %v930_v48 = vld [vmem:[%s917_s24 + $0x8] sm:$0xff]  ;;  %s6360_s24 = sld [smem:[#allocation18_spill]] }
 0x646   : > { %v2272_v51 = vadd.f32 %v4454_v47, %v2250_v50  ;;  %v928_v47 = vld [vmem:[%s5941_s30 + $0x8] sm:$0xff] }
 0x647   : > { %v2275_v52 = vadd.f32 %v2273_v49, %v5782_v9  ;;  %v2321_v9 = vld [vmem:[%s6298_s11] sm:$0xff]  ;;  %v2508_v50 = vld [vmem:[#allocation4 + $0x8] sm:$0xff] }
 0x648   : > { %v2274_v53 = vadd.f32 %v2272_v51, %v5774_v5  ;;  %v2322_v5 = vld [vmem:[%s6298_s11 + $0x8] sm:$0xff]  ;;  %v2507_v49 = vld [vmem:[#allocation4] sm:$0xff]  ;;  %v2509_v51 = vld [vmem:[#allocation4 + $0x10] sm:$0xff] }
 0x649   : > { %v2279_v54 = vsel %vm945_vm0, %v2275_v52, 0.0  ;;  %v2286_v58 = vmul.f32 %v2275_v52, %v2275_v52  ;;  %v4939_v60 = vpack.c.bf16 %v2322_v5, %v2321_v9 }
 0x64a   : > { %2280 = vadd.xlane.f32.xlu1 %v2279_v54  ;;  %v2276_v55 = vsel %vm945_vm0, %v2274_v53, 0.0  ;;  %v2285_v56 = vmul.f32 %v2274_v53, %v2274_v53 }
 0x64b   : > { %2277 = vadd.xlane.f32.xlu0 %v2276_v55  ;;  %v2290_v59 = vsel %vm945_vm0, %v2286_v58, 0.0  ;;  %4940 = vmatprep.subr.bf16.mxu1 %v4939_v60 }
 0x64c   : > { %v2287_v57 = vsel %vm945_vm0, %v2285_v56, 0.0  ;;  %4942 = vmatpush3.bf16.msra.mxu1 %v4939_v60 }
 0x64d   : > { %4944 = vmatprep.subr.bf16.mxu1 %v4943_v63 }
 0x64f   : > { %2288 = vadd.xlane.f32.xlu0 %v2287_v57 }
 0x650   : > { %4946 = vmatpush3.bf16.msra.mxu1 %v4943_v63 }
 0x651   : > { %4948 = vmatprep.subr.bf16.mxu1 %v4947_v42 }
 0x653   : > { %2291 = vadd.xlane.f32.xlu0 %v2290_v59  ;;  %v4458_v59 = vld [vmem:[%s6301_s14] ss:$0 sm:$0xff] }
 0x6d7   : > { %v2281_v4 = vpop.xlane.xlu1 %2280 }
 0x6d8   : > { %v2278_v2 = vpop.xlane.xlu0 %2277  ;;  %v2284_v8 = vmul.f32 0.03125, %v2281_v4 }
 0x6d9   : > { %v2283_v3 = vmul.f32 0.03125, %v2278_v2 }
 0x6da   : > { %v2296_v16 = vmul.f32 %v2284_v8, %v2284_v8  ;;  %v2300_v30 = vsub.f32 %v2275_v52, %v2284_v8  ;;  %v4955_v52 = vpack.c.bf16 %v2508_v50, %v2507_v49 }
 0x6db   : > { %v2295_v11 = vmul.f32 %v2283_v3, %v2283_v3  ;;  %v2299_v25 = vsub.f32 %v2274_v53, %v2283_v3  ;;  %v2510_v53 = vld [vmem:[#allocation4 + $0x18] sm:$0xff] }
 0x6dc   : > { %v2289_v6 = vpop.xlane.xlu0 %2288  ;;  %v4959_v54 = vpack.c.bf16 %v2510_v53, %v2509_v51  ;;  %4956 = vmatprep.subr.bf16.mxu0 %v4955_v52 }
 0x6dd   : > { %v2293_v12 = vmul.f32 0.03125, %v2289_v6  ;;  %4958 = vmatpush3.bf16.msra.mxu0 %v4955_v52 }
 0x6de   : > { %4960 = vmatprep.subr.bf16.mxu0 %v4959_v54 }
 0x6df   : > { %v2297_v13 = vsub.f32 %v2293_v12, %v2295_v11 }
 0x6e0   : > { %v2292_v14 = vpop.xlane.xlu0 %2291 }
 0x6e1   : > { %v2301_v17 = vadd.f32 1e-05, %v2297_v13  ;;  %v2294_v18 = vmul.f32 0.03125, %v2292_v14  ;;  %4962 = vmatpush3.bf16.msra.mxu0 %v4959_v54 }
 0x6e3   : > { %5226 = vrsqrt.f32 %v2301_v17  ;;  %v2298_v19 = vsub.f32 %v2294_v18, %v2296_v16 }
 0x6e4   : > { %4775 = vmatmul.mubr.msk.f32.vlgmr.msra.gmra.mrb[14].mxu0 %vm945_vm0, %v928_v47 }
 0x6e5   : > { %v2302_v21 = vadd.f32 1e-05, %v2298_v19 }
 0x6e7   : > { %5228 = vrsqrt.f32 %v2302_v21 }
 0x6ed   : > { %v5227_v27 = vpop.eup %5226 }
 0x6ee   : > { %v2305_v28 = vmul.f32 %v5227_v27, %v2299_v25 }
 0x6f0   : > { %v2311_v32 = vmul.f32 %v2310_v26, %v2305_v28 }
 0x6f1   : > { %v5229_v33 = vpop.eup %5228 }
 0x6f2   : > { %v2306_v34 = vmul.f32 %v5229_v33, %v2300_v30  ;;  %v5963_v35 = vadd.f32 %v2316_v29, %v2311_v32 }
 0x6f4   : > { %v2312_v36 = vmul.f32 %v2310_v26, %v2306_v34  ;;  %v2319_v37 = vadd.f32 %v5963_v35, %v5776_v7  ;;  %v2414_v7 = vadd.f32 %v930_v48, %v928_v47 }
 0x6f6   : > { %v5967_v43 = vadd.f32 %v2316_v29, %v2312_v36  ;;  %4752 = vmatprep.mubr.msk.f32.mxu1 %vm945_vm0, %v2319_v37 }
 0x6f8   : > { %v2320_v45 = vadd.f32 %v5967_v43, %v5784_v10  ;;  %v4455_v10 = vld [vmem:[%s6299_s12] ss:$0 sm:$0xff] }
 0x6fa   : > { %4753 = vmatmul.mubr.msk.f32.vlgmr.msra.gmra.mrb[8].mxu1 %vm945_vm0, %v2320_v45 }
 0x6fb   : > { %4950 = vmatpush3.bf16.msra.mxu1 %v4947_v42  ;;  %4763 = vmatprep.mubr.msk.f32.mxu1 %vm945_vm0, %v2413_v44 }
 0x6fc   : > { %4952 = vmatprep.subr.bf16.mxu1 %v4951_v46 }
 0x6ff   : > { %4954 = vmatpush3.bf16.msra.mxu1 %v4951_v46 }
 0x702   : > { %4764 = vmatmul.mubr.msk.f32.vlgmr.msra.gmra.mrb[10].mxu1 %vm945_vm0, %v2414_v7 }
 0x7b7   : > { %v4776_v42 = vpop.f32.mrb[14].mxu0 }
 0x7b8   : > { %v2590_v2 = vpop.f32.mrb[15].mxu0  ;;  %v6001_v6 = vadd.f32 %v4776_v42, %v4461_v1 }
 0x7b9   : > { %v6003_v8 = vadd.f32 %v4461_v1, %v2590_v2 }
 0x7bb   : > { %v4987_v19 = vpack.c.bf16 %v6001_v6, %v6003_v8 }
 0x7cd   : > { %v4754_v55 = vpop.f32.mrb[8].mxu1 }
 0x7ce   : > { %v2404_v56 = vpop.f32.mrb[9].mxu1  ;;  %v2410_v0 = vadd.f32 %v4754_v55, %v4455_v10 }
 0x7cf   : > { %v2405_v57 = vadd.f32 %v4455_v10, %v2404_v56 }
 0x7d0   : > { %v2600_v41 = vmul.f32 0.35355338, %v2410_v0 }
 0x7d1   : > { %v2599_v58 = vmul.f32 0.35355338, %v2405_v57 }
 0x7d3   : > { %4781 = vmatprep.mubr.msk.f32.mxu1 %vm1173_vm1, %v2599_v58 }
 0x7d5   : > { %v4765_v9 = vpop.f32.mrb[10].mxu1 }
 0x7d6   : > { %v2504_v5 = vadd.f32 %v4765_v9, %v4458_v59  ;;  %v2498_v60 = vpop.f32.mrb[11].mxu1 }
 0x7d7   : > { %v2499_v61 = vadd.f32 %v4458_v59, %v2498_v60 }
 0x7d9   : > { %v5163_v62 = vpack.i.bf16 %v2504_v5, %v2499_v61  ;;  %v4963_v63 = vpack.c.bf16 %v2504_v5, %v2499_v61 }
 0x7db   : > { %5164 = vrot.lane.b32.xlu0 %v5163_v62, %s5441_s8  ;;  %5159 = vrot.lane.b32.xlu1 %v5163_v62, %s5439_s1 }
 0x7dc   : > { %4965 = vmatprep.subr.msk.bf16.mxu1 %vm5815_vm2, %v4963_v63 }
 0x7dd   : > { %4968 = vmatpush3.bf16.xpose.msk.msra.mxu1 %vm5815_vm2, %v4963_v63 }
 0x7df   : > { %5169 = vrot.lane.b32.xlu0 %v5163_v62, %s5438_s6  ;;  %2603 = vrot.lane.b32.xlu1 %v2599_v58, %s5439_s1 }
 0x7e3   : > { %2609 = vrot.lane.b32.xlu0 %v2600_v41, %s5441_s8  ;;  %2605 = vrot.lane.b32.xlu1 %v2600_v41, %s5439_s1 }
 0x7e4   : > { %4782 = vmatmul.mubr.msk.f32.vlgmr.msra.gmra.mrb[12].mxu1 %vm1173_vm1, %v2600_v41 }
 0x7e7   : > { %2613 = vrot.lane.b32.xlu0 %v2600_v41, %s5438_s6  ;;  %2607 = vrot.lane.b32.xlu1 %v2599_v58, %s5441_s8 }
 0x7eb   : > { %2611 = vrot.lane.b32.xlu1 %v2599_v58, %s5438_s6 }
 0x84d   : > { %v5165_v3 = vpop.permute.xlu0 %5164  ;;  %v5160_v4 = vpop.permute.xlu1 %5159 }
 0x84e   : > { %v5167_v11 = vunpack.i.h.bf16 %v5165_v3  ;;  %v5166_v12 = vunpack.i.l.bf16 %v5165_v3  ;;  %v5162_v13 = vunpack.i.h.bf16 %v5160_v4  ;;  %v5161_v14 = vunpack.i.l.bf16 %v5160_v4 }
 0x850   : > { %v4975_v15 = vpack.c.bf16 %v5167_v11, %v5166_v12  ;;  %v4969_v16 = vpack.c.bf16 %v5162_v13, %v5161_v14 }
 0x851   : > { %v5170_v17 = vpop.permute.xlu0 %5169  ;;  %v2604_v18 = vpop.permute.xlu1 %2603 }
 0x852   : > { %v5172_v21 = vunpack.i.h.bf16 %v5170_v17  ;;  %v5171_v25 = vunpack.i.l.bf16 %v5170_v17  ;;  %4971 = vmatprep.subr.msk.bf16.mxu0 %vm5815_vm2, %v4969_v16  ;;  %4788 = vmatprep.mubr.msk.f32.mxu0 %vm1173_vm1, %v2604_v18 }
 0x853   : > { %4977 = vmatprep.subr.msk.bf16.mxu1 %vm5815_vm2, %v4975_v15  ;;  %4974 = vmatpush3.bf16.xpose.msk.msra.mxu0 %vm5815_vm2, %v4969_v16 }
 0x854   : > { %v4981_v26 = vpack.c.bf16 %v5172_v21, %v5171_v25  ;;  %4980 = vmatpush3.bf16.xpose.msk.msra.mxu1 %vm5815_vm2, %v4975_v15 }
 0x855   : > { %v2606_v27 = vpop.permute.xlu1 %2605  ;;  %4988 = vmatprep.subr.bf16.mxu1 %v4987_v19  ;;  %v2610_v29 = vpop.permute.xlu0 %2609 }
 0x856   : > { %4983 = vmatprep.subr.msk.bf16.mxu0 %vm5815_vm2, %v4981_v26 }
 0x859   : > { %v2608_v28 = vpop.permute.xlu1 %2607  ;;  %v2614_v32 = vpop.permute.xlu0 %2613 }
 0x85a   : > { %4789 = vmatmul.mubr.msk.f32.vlgmr.msra.gmra.mrb[16].mxu0 %vm1173_vm1, %v2606_v27  ;;  %4795 = vmatprep.mubr.msk.f32.mxu1 %vm1173_vm1, %v2608_v28 }
 0x85b   : > { %4796 = vmatmul.mubr.msk.f32.vlgmr.msra.gmra.mrb[14].mxu1 %vm1173_vm1, %v2610_v29  ;;  %4986 = vmatpush3.bf16.xpose.msk.msra.mxu0 %vm5815_vm2, %v4981_v26 }
 0x85c   : > { %4990 = vmatpush3.bf16.msra.mxu1 %v4987_v19 }
 0x85d   : > { %v2612_v30 = vpop.permute.xlu1 %2611 }
 0x85e   : > { %4802 = vmatprep.mubr.msk.f32.mxu0 %vm1173_vm1, %v2612_v30 }
 0x862   : > { %4803 = vmatmul.mubr.msk.f32.vlgmr.msra.gmra.mrb[18].mxu0 %vm1173_vm1, %v2614_v32 }
 0x8b7   : > { %v4783_v33 = vpop.f32.mrb[12].mxu1 }
 0x8b8   : > { %v2723_v34 = vpop.f32.mrb[13].mxu1  ;;  %v2984_v36 = vsel %vm1518_vm3, %v4783_v33, -inf }
 0x8b9   : > { %2985 = vmax.xlane.f32.xlu0 %v2984_v36  ;;  %v2981_v37 = vsel %vm1518_vm3, %v2723_v34, -inf }
 0x8ba   : > { %2982 = vmax.xlane.f32.xlu1 %v2981_v37 }
 0x92d   : > { %v4790_v38 = vpop.f32.mrb[16].mxu0 }
 0x92e   : > { %v2806_v39 = vpop.f32.mrb[17].mxu0  ;;  %v4797_v40 = vpop.f32.mrb[14].mxu1  ;;  %v2990_v31 = vsel %vm1518_vm3, %v4790_v38, -inf }
 0x92f   : > { %2991 = vmax.xlane.f32.xlu1 %v2990_v31  ;;  %v2889_v44 = vpop.f32.mrb[15].mxu1  ;;  %v2987_v45 = vsel %vm1518_vm3, %v2806_v39, -inf  ;;  %v2996_v46 = vsel %vm1518_vm3, %v4797_v40, -inf }
 0x930   : > { %2988 = vmax.xlane.f32.xlu0 %v2987_v45  ;;  %v2993_v47 = vsel %vm1518_vm3, %v2889_v44, -inf }
 0x933   : > { %2997 = vmax.xlane.f32.xlu1 %v2996_v46 }
 0x934   : > { %2994 = vmax.xlane.f32.xlu0 %v2993_v47 }
 0x935   : > { %v4804_v48 = vpop.f32.mrb[18].mxu0 }
 0x936   : > { %v2972_v7 = vpop.f32.mrb[19].mxu0  ;;  %v3002_v49 = vsel %vm1518_vm3, %v4804_v48, -inf }
 0x937   : > { %3003 = vmax.xlane.f32.xlu1 %v3002_v49  ;;  %v2999_v50 = vsel %vm1518_vm3, %v2972_v7, -inf }
 0x938   : > { %3000 = vmax.xlane.f32.xlu0 %v2999_v50 }
 0x946   : > { %v2986_v51 = vpop.xlane.xlu0 %2985 }
 0x947   : > { %v3006_v52 = vsub.f32 %v4783_v33, %v2986_v51  ;;  %v2983_v53 = vpop.xlane.xlu1 %2982 }
 0x948   : > { %v3005_v54 = vsub.f32 %v2723_v34, %v2983_v53  ;;  %v5178_v34 = vpack.i.bf16 %v6001_v6, %v6003_v8 }
 0x949   : > { %v3015_v10 = vmul.f32 1.442695, %v3006_v52 }
 0x94a   : > { %v3013_v55 = vmul.f32 1.442695, %v3005_v54 }
 0x94b   : > { %5230 = vpow2.f32 %v3015_v10 }
 0x94c   : > { %5232 = vpow2.f32 %v3013_v55 }
 0x955   : > { %v5231_v56 = vpop.eup %5230 }
 0x956   : > { %v5233_v57 = vpop.eup %5232  ;;  %v3032_v58 = vsel %vm1518_vm3, %v5231_v56, 0.0 }
 0x957   : > { %3033 = vadd.xlane.f32.xlu1 %v3032_v58  ;;  %v3029_v59 = vsel %vm1518_vm3, %v5233_v57, 0.0 }
 0x958   : > { %3030 = vadd.xlane.f32.xlu0 %v3029_v59 }
 0x9bc   : > { %v2992_v9 = vpop.xlane.xlu1 %2991 }
 0x9bd   : > { %v3008_v5 = vsub.f32 %v4790_v38, %v2992_v9  ;;  %v2989_v60 = vpop.xlane.xlu0 %2988 }
 0x9be   : > { %v3007_v61 = vsub.f32 %v2806_v39, %v2989_v60  ;;  %v3393_v60 = vld [vmem:[%s6304_s17] sm:$0xff] }
 0x9bf   : > { %v3019_v62 = vmul.f32 1.442695, %v3008_v5 }
 0x9c0   : > { %v3017_v63 = vmul.f32 1.442695, %v3007_v61  ;;  %v2998_v0 = vpop.xlane.xlu1 %2997 }
 0x9c1   : > { %5234 = vpow2.f32 %v3019_v62  ;;  %v3010_v41 = vsub.f32 %v4797_v40, %v2998_v0  ;;  %v2995_v42 = vpop.xlane.xlu0 %2994 }
 0x9c2   : > { %5236 = vpow2.f32 %v3017_v63  ;;  %v3009_v1 = vsub.f32 %v2889_v44, %v2995_v42 }
 0x9c3   : > { %v3023_v2 = vmul.f32 1.442695, %v3010_v41 }
 0x9c4   : > { %v3021_v3 = vmul.f32 1.442695, %v3009_v1  ;;  %v3004_v4 = vpop.xlane.xlu1 %3003  ;;  %v3394_v1 = vld [vmem:[%s6304_s17 + $0x8] sm:$0xff] }
 0x9c5   : > { %5238 = vpow2.f32 %v3023_v2  ;;  %v3012_v11 = vsub.f32 %v4804_v48, %v3004_v4  ;;  %v3001_v12 = vpop.xlane.xlu0 %3000 }
 0x9c6   : > { %5240 = vpow2.f32 %v3021_v3  ;;  %v3011_v13 = vsub.f32 %v2972_v7, %v3001_v12  ;;  %v3780_v12 = vld [vmem:[%s6360_s24] sm:$0xff] }
 0x9c7   : > { %v3027_v14 = vmul.f32 1.442695, %v3012_v11  ;;  %v3395_v11 = vld [vmem:[%s6304_s17 + $0x10] sm:$0xff] }
 0x9c8   : > { %v3025_v15 = vmul.f32 1.442695, %v3011_v13  ;;  %v5442_v13 = vmov 1  }
 0x9c9   : > { %5242 = vpow2.f32 %v3027_v14  ;;  %5188 = vset.pattern.permute.xlu1 %v5442_v13  ;;  %5189 = vset.pattern.permute.xlu0 %v5442_v13 }
 0x9ca   : > { %5244 = vpow2.f32 %v3025_v15 }
 0x9cb   : > { %v6035_v16 = vpop.eup %5234 }
 0x9cc   : > { %v5237_v17 = vpop.eup %5236  ;;  %v3038_v18 = vsel %vm1518_vm3, %v6035_v16, 0.0 }
 0x9cd   : > { %3039 = vadd.xlane.f32.xlu1 %v3038_v18  ;;  %v3035_v19 = vsel %vm1518_vm3, %v5237_v17, 0.0  ;;  %v3396_v18 = vld [vmem:[%s6304_s17 + $0x18] sm:$0xff] }
 0x9ce   : > { %3036 = vadd.xlane.f32.xlu0 %v3035_v19 }
 0x9cf   : > { %v5239_v21 = vpop.eup %5238 }
 0x9d0   : > { %v5241_v25 = vpop.eup %5240  ;;  %v3044_v26 = vsel %vm1518_vm3, %v5239_v21, 0.0 }
 0x9d1   : > { %3045 = vadd.xlane.f32.xlu1 %v3044_v26  ;;  %v3041_v27 = vsel %vm1518_vm3, %v5241_v25, 0.0  ;;  %v4496_v26 = vld [vmem:[%s6305_s18] ss:$0 sm:$0xff] }
 0x9d2   : > { %3042 = vadd.xlane.f32.xlu0 %v3041_v27 }
 0x9d3   : > { %v6042_v28 = vpop.eup %5242 }
 0x9d4   : > { %v6044_v29 = vpop.eup %5244  ;;  %v3050_v30 = vsel %vm1518_vm3, %v6042_v28, 0.0 }
 0x9d5   : > { %3051 = vadd.xlane.f32.xlu1 %v3050_v30  ;;  %v3047_v32 = vsel %vm1518_vm3, %v6044_v29, 0.0 }
 0x9d6   : > { %3048 = vadd.xlane.f32.xlu0 %v3047_v32 }
 0x9e4   : > { %v3034_v33 = vpop.xlane.xlu1 %3033 }
 0x9e5   : > { %5246 = vrcp.f32 %v3034_v33  ;;  %v3031_v36 = vpop.xlane.xlu0 %3030 }
 0x9e6   : > { %5248 = vrcp.f32 %v3031_v36  ;;  %5179 = vrot.lane.b32.xlu1 %v5178_v34, %s5441_s8 }
 0x9ea   : > { %5184 = vrot.lane.b32.xlu1 %v5178_v34, %s5438_s6  ;;  %s6362_s6 = sld [smem:[#allocation25_spill]] }
 0x9ec   : > { %5174 = vrot.lane.b32.xlu0 %v5178_v34, %s5439_s1 }
 0x9ee   : > { %3797 = vperm.xlu1 %5188, %v3780_v12  }
 0x9ef   : > { %v5247_v37 = vpop.eup %5246 }
 0x9f0   : > { %v5249_v38 = vpop.eup %5248  ;;  %v3062_v40 = vmul.f32 %v5247_v37, %v5231_v56 }
 0x9f1   : > { %v3061_v39 = vmul.f32 %v5249_v38, %v5233_v57 }
 0x9f3   : > { %4809 = vmatprep.mubr.msk.f32.mxu1 %vm1518_vm3, %v3061_v39 }
 0x9f4   : > { %4810 = vmatmul.mubr.msk.f32.vlgmr.msra.gmra.mrb[16].mxu1 %vm1518_vm3, %v3062_v40 }
 0xa5a   : > { %v3040_v31 = vpop.xlane.xlu1 %3039 }
 0xa5b   : > { %v3037_v44 = vpop.xlane.xlu0 %3036 }
 0xa5c   : > { %5250 = vrcp.f32 %v3037_v44  ;;  %v3917_v44 = vld [vmem:[%s6308_s21] sm:$0xff] }
 0xa5e   : > { %v3046_v6 = vpop.xlane.xlu1 %3045 }
 0xa5f   : > { %5252 = vrcp.f32 %v3046_v6  ;;  %v3043_v8 = vpop.xlane.xlu0 %3042  ;;  %v3918_v6 = vld [vmem:[%s6308_s21 + $0x8] sm:$0xff] }
 0xa60   : > { %5254 = vrcp.f32 %v3043_v8  ;;  %v5003_v8 = vpack.c.bf16 %v3918_v6, %v3917_v44 }
 0xa61   : > { %5256 = vrcp.f32 %v3040_v31  ;;  %v5445_v31 = vmov 3  }
 0xa62   : > { %v3052_v45 = vpop.xlane.xlu1 %3051 }
 0xa63   : > { %v3049_v46 = vpop.xlane.xlu0 %3048 }
 0xa64   : > { %5258 = vrcp.f32 %v3049_v46  ;;  %v3920_v46 = vld [vmem:[%s6308_s21 + $0x18] sm:$0xff] }
 0xa65   : > { %5260 = vrcp.f32 %v3052_v45  ;;  %v3919_v45 = vld [vmem:[%s6308_s21 + $0x10] sm:$0xff] }
 0xa66   : > { %v5251_v47 = vpop.eup %5250  ;;  %v5180_v48 = vpop.permute.xlu1 %5179 }
 0xa67   : > { %v5182_v7 = vunpack.i.h.bf16 %v5180_v48  ;;  %v5181_v49 = vunpack.i.l.bf16 %v5180_v48  ;;  %v5175_v50 = vpop.permute.xlu0 %5174  ;;  %v3063_v51 = vmul.f32 %v5251_v47, %v5237_v17  ;;  %v5007_v47 = vpack.c.bf16 %v3920_v46, %v3919_v45 }
 0xa68   : > { %v5177_v52 = vunpack.i.h.bf16 %v5175_v50  ;;  %v5176_v53 = vunpack.i.l.bf16 %v5175_v50 }
 0xa69   : > { %v5253_v54 = vpop.eup %5252  ;;  %v4995_v10 = vpack.c.bf16 %v5182_v7, %v5181_v49  ;;  %4816 = vmatprep.mubr.msk.f32.mxu1 %vm1518_vm3, %v3063_v51 }
 0xa6a   : > { %v5255_v55 = vpop.eup %5254  ;;  %v4991_v56 = vpack.c.bf16 %v5177_v52, %v5176_v53  ;;  %v5185_v57 = vpop.permute.xlu1 %5184  ;;  %v3066_v61 = vmul.f32 %v5253_v54, %v5239_v21 }
 0xa6b   : > { %v5257_v58 = vpop.eup %5256  ;;  %v5187_v59 = vunpack.i.h.bf16 %v5185_v57  ;;  %v5186_v9 = vunpack.i.l.bf16 %v5185_v57  ;;  %4996 = vmatprep.subr.bf16.mxu0 %v4995_v10  ;;  %v3065_v5 = vmul.f32 %v5255_v55, %v5241_v25  ;;  %v5443_v25 = vmov 0  }
 0xa6c   : > { %4992 = vmatprep.subr.bf16.mxu1 %v4991_v56  ;;  %4998 = vmatpush3.bf16.msra.mxu0 %v4995_v10  ;;  %v3064_v0 = vmul.f32 %v5257_v58, %v6035_v16 }
 0xa6d   : > { %v4999_v62 = vpack.c.bf16 %v5187_v59, %v5186_v9  ;;  %4994 = vmatpush3.bf16.msra.mxu1 %v4991_v56  ;;  %4823 = vmatprep.mubr.msk.f32.mxu0 %vm1518_vm3, %v3065_v5  ;;  %v6121_v5 = vsub.s32 1, %v5945_v20 }
 0xa6e   : > { %v5259_v63 = vpop.eup %5258  ;;  %4833 = vmatprep.subr.mxu0 %v3393_v60  ;;  %5190 = vset.pattern.permute.xlu1 %v5443_v25  ;;  %v6118_v48 = vpop.permute.xlu1 %3797  ;;  %v3881_v25 = vsub.s32 6, %v5945_v20 }
 0xa6f   : > { %v5261_v41 = vpop.eup %5260  ;;  %4824 = vmatmul.mubr.msk.f32.vlgmr.msra.gmra.mrb[20].mxu0 %vm1518_vm3, %v3066_v61  ;;  %5000 = vmatprep.subr.bf16.mxu1 %v4999_v62  ;;  %v3067_v42 = vmul.f32 %v5259_v63, %v6044_v29  ;;  %v6126_v61 = vsub.s32 4, %v5945_v20  ;;  %v3771_v63 = vrot.slane %v5950_v23, %v6121_v5 }
 0xa70   : > { %4817 = vmatmul.mubr.msk.f32.vlgmr.msra.gmra.mrb[18].mxu1 %vm1518_vm3, %v3064_v0  ;;  %4834 = vmatpush3.msra.mxu0 %v3393_v60  ;;  %v3068_v2 = vmul.f32 %v5261_v41, %v6042_v28 }
 0xa71   : > { %5002 = vmatpush3.bf16.msra.mxu1 %v4999_v62  ;;  %4830 = vmatprep.mubr.msk.f32.mxu1 %vm1518_vm3, %v3067_v42  ;;  %v3777_v41 = vrot.slane %v5950_v23, %v6126_v61 }
 0xa72   : > { %4838 = vmatprep.subr.mxu0 %v3394_v1  ;;  %5004 = vmatprep.subr.bf16.mxu1 %v5003_v8 }
 0xa74   : > { %4831 = vmatmul.mubr.msk.f32.vlgmr.msra.gmra.mrb[20].mxu1 %vm1518_vm3, %v3068_v2 }
 0xa75   : > { %5006 = vmatpush3.bf16.msra.mxu1 %v5003_v8 }
 0xa76   : > { %5008 = vmatprep.subr.bf16.mxu1 %v5007_v47 }
 0xa79   : > { %5010 = vmatpush3.bf16.msra.mxu1 %v5007_v47 }
 0xac7   : > { %v4811_v3 = vpop.f32.mrb[16].mxu1 }
 0xac8   : > { %v3141_v4 = vpop.f32.mrb[17].mxu1 }
 0xac9   : > { %4835 = vmatprep.mubr.msk.f32.mxu0 %vm1173_vm1, %v3141_v4 }
 0xaca   : > { %4836 = vmatmul.mubr.msk.f32.vlgmr.msra.gmra.mrb[22].mxu0 %vm1173_vm1, %v4811_v3 }
 0xacb   : > { %4839 = vmatpush3.msra.mxu0 %v3394_v1 }
 0xacc   : > { %4843 = vmatprep.subr.mxu0 %v3395_v11 }
 0xb42   : > { %v4825_v14 = vpop.f32.mrb[20].mxu0 }
 0xb43   : > { %v4818_v15 = vpop.f32.mrb[18].mxu1  ;;  %v3303_v16 = vpop.f32.mrb[21].mxu0 }
 0xb44   : > { %v3222_v17 = vpop.f32.mrb[19].mxu1 }
 0xb45   : > { %4840 = vmatprep.mubr.msk.f32.mxu0 %vm1173_vm1, %v3222_v17  ;;  %v3887_v17 = vsub.s32 7, %v5945_v20 }
 0xb46   : > { %4841 = vmatmul.mubr.msk.f32.vlgmr.msra.gmra.mrb[22].mxu0 %vm1173_vm1, %v4818_v15 }
 0xb47   : > { %v4832_v19 = vpop.f32.mrb[20].mxu1  ;;  %4844 = vmatpush3.msra.mxu0 %v3395_v11  ;;  %4845 = vmatprep.mubr.msk.f32.mxu0 %vm1173_vm1, %v3303_v16  ;;  %v3782_v16 = vld [vmem:[#allocation7] sm:$0xff] }
 0xb48   : > { %v3384_v21 = vpop.f32.mrb[21].mxu1  ;;  %4848 = vmatprep.subr.mxu0 %v3396_v18 }
 0xb4e   : > { %4846 = vmatmul.mubr.msk.f32.vlgmr.msra.gmra.mrb[22].mxu0 %vm1173_vm1, %v4825_v14 }
 0xb4f   : > { %4849 = vmatpush3.msra.mxu0 %v3396_v18  ;;  %4850 = vmatprep.mubr.msk.f32.mxu0 %vm1173_vm1, %v3384_v21 }
 0xb56   : > { %4851 = vmatmul.mubr.msk.f32.vlgmr.msra.gmra.mrb[22].mxu0 %vm1173_vm1, %v4832_v19  ;;  %v6147_v19 = vsub.s32 2, %v5945_v20 }
 0xc29   : > { %v4852_v27 = vpop.f32.mrb[22].mxu0 }
 0xc2a   : > { %v3735_v28 = vadd.f32 %v4852_v27, %v4496_v26  ;;  %v3712_v29 = vpop.f32.mrb[23].mxu0 }
 0xc2b   : > { %v3734_v30 = vadd.f32 %v4496_v26, %v3712_v29  ;;  %v6153_v26 = vsub.s32 5, %v5945_v20  ;;  %v3827_v29 = vrot.slane %v3782_v16, %v6126_v61 }
 0xc2c   : > { %v3737_v32 = vadd.f32 %v3735_v28, %v5967_v43  ;;  %v5444_v43 = vmov 2  }
 0xc2d   : > { %v6094_v33 = vadd.f32 %v3734_v30, %v5963_v35  ;;  %v3781_v35 = vld [vmem:[%s6360_s24 + $0x8] sm:$0xff]  ;;  %v3849_v30 = vrot.slane %v3782_v16, %v6121_v5 }
 0xc2e   : > { %v3741_v34 = vsel %vm945_vm0, %v3737_v32, 0.0  ;;  %v3747_v37 = vmul.f32 %v3737_v32, %v3737_v32 }
 0xc2f   : > { %3742 = vadd.xlane.f32.xlu1 %v3741_v34  ;;  %v3738_v36 = vsel %vm945_vm0, %v6094_v33, 0.0  ;;  %v3746_v39 = vmul.f32 %v6094_v33, %v6094_v33 }
 0xc30   : > { %3739 = vadd.xlane.f32.xlu0 %v3738_v36  ;;  %v3751_v38 = vsel %vm945_vm0, %v3747_v37, 0.0  ;;  %v3843_v37 = vrot.slane %v3782_v16, %v5948_v22 }
 0xc31   : > { %v3748_v40 = vsel %vm945_vm0, %v3746_v39, 0.0 }
 0xc34   : > { %3752 = vadd.xlane.f32.xlu0 %v3751_v38 }
 0xc38   : > { %3749 = vadd.xlane.f32.xlu0 %v3748_v40  ;;  %v3857_v40 = vrot.slane %v3782_v16, %v6147_v19 }
 0xc40   : > { %3786 = vperm.xlu1 %5190, %v3780_v12  }
 0xc44   : > { %3791 = vperm.xlu1 %5190, %v3781_v35  }
 0xc48   : > { %5191 = vset.pattern.permute.xlu1 %v5444_v43  ;;  %v3882_v43 = vrot.slane %v3782_v16, %v3881_v25 }
 0xc49   : > { %3868 = vperm.xlu1 %5191, %v3780_v12  }
 0xc4d   : > { %3872 = vperm.xlu1 %5191, %v3781_v35  }
 0xc4e   : > { %3801 = vperm.xlu0 %5189, %v3781_v35  }
 0xc51   : > { %5192 = vset.pattern.permute.xlu1 %v5445_v31 }
 0xc52   : > { %3906 = vperm.xlu1 %5192, %v3780_v12   ;;  %5193 = vset.pattern.permute.xlu0 %v5445_v31  ;;  %v3835_v31 = vrot.slane %v3782_v16, %v6153_v26 }
 0xc56   : > { %3910 = vperm.xlu1 %5192, %v3781_v35  }
 0xcbc   : > { %v3743_v7 = vpop.xlane.xlu1 %3742 }
 0xcbd   : > { %v3740_v49 = vpop.xlane.xlu0 %3739  ;;  %v3745_v50 = vmul.f32 0.03125, %v3743_v7 }
 0xcbe   : > { %v3744_v53 = vmul.f32 0.03125, %v3740_v49 }
 0xcbf   : > { %v3757_v52 = vmul.f32 %v3745_v50, %v3745_v50  ;;  %v3761_v62 = vsub.f32 %v3737_v32, %v3745_v50  ;;  %v3821_v32 = vrot.slane %v3782_v16, %v5953_v24  ;;  %v4497_v50 = vld [vmem:[#allocation7 + $0x8] ss:$0 sm:$0xff] }
 0xcc0   : > { %v3756_v56 = vmul.f32 %v3744_v53, %v3744_v53  ;;  %v6123_v60 = vpop.permute.xlu1 %3786  ;;  %v3760_v2 = vsub.f32 %v6094_v33, %v3744_v53  ;;  %v3888_v33 = vrot.slane %v3782_v16, %v3887_v17 }
 0xcc1   : > { %v3753_v51 = vpop.xlane.xlu0 %3752 }
 0xcc2   : > { %v3755_v54 = vmul.f32 0.03125, %v3753_v51 }
 0xcc4   : > { %v3759_v10 = vsub.f32 %v3755_v54, %v3757_v52  ;;  %v6132_v1 = vpop.permute.xlu1 %3791 }
 0xcc5   : > { %v3750_v55 = vpop.xlane.xlu0 %3749 }
 0xcc6   : > { %v3763_v57 = vadd.f32 1e-05, %v3759_v10  ;;  %v3754_v58 = vmul.f32 0.03125, %v3750_v55 }
 0xcc8   : > { %5262 = vrsqrt.f32 %v3763_v57  ;;  %v3758_v59 = vsub.f32 %v3754_v58, %v3756_v56  ;;  %v6139_v15 = vpop.permute.xlu1 %3868 }
 0xcca   : > { %v3762_v9 = vadd.f32 1e-05, %v3758_v59 }
 0xccc   : > { %5264 = vrsqrt.f32 %v3762_v9  ;;  %v6167_v39 = vpop.permute.xlu1 %3872 }
 0xccd   : > { %v6137_v13 = vpop.permute.xlu0 %3801 }
 0xcd2   : > { %v5263_v0 = vpop.eup %5262 }
 0xcd3   : > { %v3767_v42 = vmul.f32 %v5263_v0, %v3761_v62 }
 0xcd5   : > { %v3773_v3 = vmul.f32 %v3771_v63, %v3767_v42 }
 0xcd6   : > { %v5265_v4 = vpop.eup %5264 }
 0xcd7   : > { %v6135_v11 = vadd.f32 %v3777_v41, %v3773_v3  ;;  %v3766_v12 = vmul.f32 %v5265_v4, %v3760_v2 }
 0xcd9   : > { %v3772_v14 = vmul.f32 %v3771_v63, %v3766_v12  ;;  %v3805_v23 = vmul.f32 %v6137_v13, %v6135_v11  ;;  %v3795_v21 = vmul.f32 %v6132_v1, %v6135_v11  ;;  %v3851_v8 = vmul.f32 %v3849_v30, %v6135_v11  ;;  %v6187_v63 = vpop.permute.xlu1 %3906 }
 0xcda   : > { %v3829_v45 = vmul.f32 %v3827_v29, %v6135_v11  ;;  %v3890_v49 = vmul.f32 %v3888_v33, %v6135_v11 }
 0xcdb   : > { %v6142_v18 = vadd.f32 %v3777_v41, %v3772_v14  ;;  %v3807_v38 = vrot.slane %v3805_v23, 7  ;;  %v3814_v35 = vrot.slane %v3795_v21, 1 }
 0xcdd   : > { %v3794_v27 = vmul.f32 %v6123_v60, %v6142_v18  ;;  %v3804_v28 = vmul.f32 %v6118_v48, %v6142_v18  ;;  %v3850_v7 = vmul.f32 %v3849_v30, %v6142_v18  ;;  %v3828_v56 = vmul.f32 %v3827_v29, %v6142_v18 }
 0xcde   : > { %v3889_v57 = vmul.f32 %v3888_v33, %v6142_v18 }
 0xcdf   : > { %v3813_v34 = vrot.slane %v3794_v27, 1  ;;  %v3806_v36 = vrot.slane %v3804_v28, 7 }
 0xce1   : > { %v3811_v44 = vsel %vm3810_vm5, %v3806_v36, %v3807_v38  ;;  %v3812_v6 = vsel %vm3810_vm5, %v3807_v38, %v3806_v36  ;;  %v3816_v46 = vsel %vm3815_vm4, %v3813_v34, %v3814_v35  ;;  %v3817_v47 = vsel %vm3815_vm4, %v3814_v35, %v3813_v34  ;;  %v6194_v38 = vpop.permute.xlu1 %3910 }
 0xce2   : > { %v3822_v51 = vmul.f32 %v3821_v32, %v3812_v6  ;;  %v3823_v52 = vmul.f32 %v3821_v32, %v3811_v44  ;;  %v3844_v53 = vmul.f32 %v3843_v37, %v3812_v6  ;;  %v3845_v54 = vmul.f32 %v3843_v37, %v3811_v44 }
 0xce3   : > { %v3883_v10 = vmul.f32 %v3882_v43, %v3812_v6  ;;  %v3884_v55 = vmul.f32 %v3882_v43, %v3811_v44  ;;  %v3858_v58 = vmul.f32 %v3857_v40, %v3816_v46  ;;  %v3859_v59 = vmul.f32 %v3857_v40, %v3817_v47 }
 0xce4   : > { %v3852_v9 = vadd.f32 %v3850_v7, %v3844_v53  ;;  %v3853_v62 = vadd.f32 %v3851_v8, %v3845_v54  ;;  %v3897_v0 = vmul.f32 %v4497_v50, %v3816_v46  ;;  %v3898_v41 = vmul.f32 %v4497_v50, %v3817_v47  ;;  %v4107_v7 = vld [vmem:[%s6361_s9] sm:$0xff] }
 0xce5   : > { %v3891_v42 = vadd.f32 %v3889_v57, %v3883_v10  ;;  %v3892_v2 = vadd.f32 %v3890_v49, %v3884_v55  ;;  %v3830_v3 = vadd.f32 %v3828_v56, %v3822_v51  ;;  %v3831_v14 = vadd.f32 %v3829_v45, %v3823_v52  ;;  %v4108_v49 = vld [vmem:[%s6361_s9 + $0x8] sm:$0xff]  ;;  %v4109_v51 = vld [vmem:[%s6361_s9 + $0x10] sm:$0xff]  ;;  %v4110_v52 = vld [vmem:[%s6361_s9 + $0x18] sm:$0xff] }
 0xce6   : > { %v3860_v4 = vadd.f32 %v3858_v58, %v3852_v9  ;;  %v3861_v12 = vadd.f32 %v3859_v59, %v3853_v62  ;;  %v3836_v21 = vmul.f32 %v3835_v31, %v3816_v46  ;;  %v3837_v29 = vmul.f32 %v3835_v31, %v3817_v47  ;;  %v4111_v53 = vld [vmem:[%s6361_s9 + $0x20] sm:$0xff]  ;;  %v4112_v10 = vld [vmem:[%s6361_s9 + $0x28] sm:$0xff]  ;;  %v4113_v56 = vld [vmem:[%s6361_s9 + $0x30] sm:$0xff] }
 0xce7   : > { %v3899_v16 = vadd.f32 %v3897_v0, %v3891_v42  ;;  %v3900_v23 = vadd.f32 %v3898_v41, %v3892_v2  ;;  %v5011_v50 = vpack.c.bf16 %v4108_v49, %v4107_v7  ;;  %v5015_v54 = vpack.c.bf16 %v4110_v52, %v4109_v51  ;;  %v4114_v57 = vld [vmem:[%s6361_s9 + $0x38] sm:$0xff]  ;;  %v4498_v59 = vld [vmem:[%s6362_s6] ss:$0 sm:$0xff] }
 0xce8   : > { %v3862_v27 = vrot.slane %v3860_v4, 4  ;;  %v3863_v28 = vrot.slane %v3861_v12, 4  ;;  %v3838_v33 = vadd.f32 %v3836_v21, %v3830_v3  ;;  %v3839_v36 = vadd.f32 %v3837_v29, %v3831_v14  ;;  %v4011_v62 = vld [vmem:[#allocation9] sm:$0xff] }
 0xce9   : > { %v3901_v30 = vrot.slane %v3899_v16, 4  ;;  %v3902_v32 = vrot.slane %v3900_v23, 4  ;;  %5012 = vmatprep.subr.bf16.mxu1 %v5011_v50  ;;  %v5019_v55 = vpack.c.bf16 %v4112_v10, %v4111_v53  ;;  %v5023_v58 = vpack.c.bf16 %v4114_v57, %v4113_v56 }
 0xcea   : > { %v3866_v34 = vsel %vm3864_vm6, %v3863_v28, %v3862_v27  ;;  %v3865_v37 = vsel %vm3864_vm6, %v3862_v27, %v3863_v28  ;;  %v4034_v3 = vrot.slane %v4011_v62, %v6126_v61  ;;  %v4056_v16 = vrot.slane %v4011_v62, %v6121_v5 }
 0xceb   : > { %v3875_v40 = vmul.f32 %v6139_v15, %v3866_v34  ;;  %v3876_v35 = vmul.f32 %v6167_v39, %v3865_v37  ;;  %v3903_v43 = vsel %vm3864_vm6, %v3901_v30, %v3902_v32  ;;  %v3904_v31 = vsel %vm3864_vm6, %v3902_v32, %v3901_v30 }
 0xcec   : > { %v3913_v8 = vmul.f32 %v6187_v63, %v3903_v43  ;;  %v3914_v45 = vmul.f32 %v6194_v38, %v3904_v31  ;;  %v4086_v23 = vrot.slane %v4011_v62, %v3887_v17  ;;  %v4080_v21 = vrot.slane %v4011_v62, %v3881_v25  ;;  %v4501_v43 = vld [vmem:[#allocation9 + $0x8] ss:$0 sm:$0xff] }
 0xced   : > { %v3877_v44 = vadd.f32 %v3875_v40, %v3838_v33  ;;  %v3878_v6 = vadd.f32 %v3876_v35, %v3839_v36  ;;  %v4050_v61 = vrot.slane %v4011_v62, %v5948_v22  ;;  %v4042_v5 = vrot.slane %v4011_v62, %v6153_v26 }
 0xcee   : > { %v4064_v33 = vrot.slane %v4011_v62, %v6147_v19 }
 0xcef   : > { %v3915_v46 = vadd.f32 %v3913_v8, %v3877_v44  ;;  %v3916_v47 = vadd.f32 %v3914_v45, %v3878_v6 }
 0xcf1   : > { %4861 = vmatprep.mubr.msk.f32.mxu1 %vm945_vm0, %v3915_v46 }
 0xcf2   : > { %4862 = vmatmul.mubr.msk.f32.vlgmr.msra.gmra.mrb[22].mxu1 %vm945_vm0, %v3916_v47 }
 0xcf3   : > { %5014 = vmatpush3.bf16.msra.mxu1 %v5011_v50 }
 0xcf4   : > { %5016 = vmatprep.subr.bf16.mxu1 %v5015_v54 }
 0xcf7   : > { %5018 = vmatpush3.bf16.msra.mxu1 %v5015_v54 }
 0xcf8   : > { %5020 = vmatprep.subr.bf16.mxu1 %v5019_v55 }
 0xcfb   : > { %5022 = vmatpush3.bf16.msra.mxu1 %v5019_v55 }
 0xcfc   : > { %5024 = vmatprep.subr.bf16.mxu1 %v5023_v58 }
 0xcff   : > { %5026 = vmatpush3.bf16.msra.mxu1 %v5023_v58 }
 0xdc5   : > { %v4863_v9 = vpop.f32.mrb[22].mxu1 }
 0xdc6   : > { %v4006_v0 = vadd.f32 %v4863_v9, %v4498_v59  ;;  %v4000_v41 = vpop.f32.mrb[23].mxu1 }
 0xdc7   : > { %v4001_v42 = vadd.f32 %v4498_v59, %v4000_v41 }
 0xdc8   : > { %v4010_v2 = vmax.f32 %v4006_v0, 0.0 }
 0xdc9   : > { %v4009_v4 = vmax.f32 %v4001_v42, 0.0 }
 0xdca   : > { %v4014_v12 = vmul.f32 %v4010_v2, %v6132_v1  ;;  %v4016_v14 = vmul.f32 %v4010_v2, %v6137_v13  ;;  %v4028_v1 = vrot.slane %v4011_v62, %v5953_v24  ;;  %v4058_v17 = vmul.f32 %v4056_v16, %v4010_v2 }
 0xdcb   : > { %v4013_v27 = vmul.f32 %v4009_v4, %v6123_v60  ;;  %v4015_v28 = vmul.f32 %v4009_v4, %v6118_v48  ;;  %v4035_v34 = vmul.f32 %v4034_v3, %v4009_v4  ;;  %v4057_v36 = vmul.f32 %v4056_v16, %v4009_v4 }
 0xdcc   : > { %v4018_v29 = vrot.slane %v4016_v14, 7  ;;  %v4022_v30 = vrot.slane %v4014_v12, 1  ;;  %v4087_v25 = vmul.f32 %v4086_v23, %v4009_v4  ;;  %v4036_v44 = vmul.f32 %v4034_v3, %v4010_v2 }
 0xdcd   : > { %v4017_v32 = vrot.slane %v4015_v28, 7  ;;  %v4021_v13 = vrot.slane %v4013_v27, 1  ;;  %v4088_v50 = vmul.f32 %v4086_v23, %v4010_v2 }
 0xdcf   : > { %v4019_v60 = vsel %vm3810_vm5, %v4017_v32, %v4018_v29  ;;  %v4020_v48 = vsel %vm3810_vm5, %v4018_v29, %v4017_v32  ;;  %v4024_v22 = vsel %vm3815_vm4, %v4022_v30, %v4021_v13  ;;  %v4023_v24 = vsel %vm3815_vm4, %v4021_v13, %v4022_v30 }
 0xdd0   : > { %v4051_v37 = vmul.f32 %v4050_v61, %v4020_v48  ;;  %v4052_v40 = vmul.f32 %v4050_v61, %v4019_v60  ;;  %v4081_v35 = vmul.f32 %v4080_v21, %v4020_v48  ;;  %v4029_v31 = vmul.f32 %v4028_v1, %v4020_v48 }
 0xdd1   : > { %v4030_v6 = vmul.f32 %v4028_v1, %v4019_v60  ;;  %v4043_v8 = vmul.f32 %v4042_v5, %v4023_v24  ;;  %v4065_v45 = vmul.f32 %v4064_v33, %v4023_v24  ;;  %v4066_v51 = vmul.f32 %v4064_v33, %v4024_v22 }
 0xdd2   : > { %v4059_v46 = vadd.f32 %v4057_v36, %v4051_v37  ;;  %v4089_v47 = vadd.f32 %v4087_v25, %v4081_v35  ;;  %v4037_v7 = vadd.f32 %v4035_v34, %v4029_v31  ;;  %v4060_v49 = vadd.f32 %v4058_v17, %v4052_v40 }
 0xdd3   : > { %v4082_v52 = vmul.f32 %v4080_v21, %v4019_v60  ;;  %v4095_v53 = vmul.f32 %v4501_v43, %v4023_v24  ;;  %v4044_v54 = vmul.f32 %v4042_v5, %v4024_v22  ;;  %v4038_v56 = vadd.f32 %v4036_v44, %v4030_v6 }
 0xdd4   : > { %v4045_v10 = vadd.f32 %v4043_v8, %v4037_v7  ;;  %v4067_v55 = vadd.f32 %v4065_v45, %v4059_v46  ;;  %v4068_v57 = vadd.f32 %v4066_v51, %v4060_v49  ;;  %v4096_v59 = vmul.f32 %v4501_v43, %v4024_v22  ;;  %v5270_v46 = vld [vmem:[#allocation6] sm:$0x3f] }
 0xdd5   : > { %v4090_v58 = vadd.f32 %v4088_v50, %v4082_v52  ;;  %v4097_v9 = vadd.f32 %v4095_v53, %v4089_v47  ;;  %v4046_v0 = vadd.f32 %v4044_v54, %v4038_v56  ;;  %v4239_v47 = vrot.slane %v5270_v46, %v6147_v19 }
 0xdd6   : > { %v4069_v62 = vrot.slane %v4067_v55, 4  ;;  %v4070_v41 = vrot.slane %v4068_v57, 4  ;;  %v4245_v51 = vrot.slane %v5270_v46, %v6153_v26 }
 0xdd7   : > { %v4098_v42 = vadd.f32 %v4096_v59, %v4090_v58  ;;  %v4099_v3 = vrot.slane %v4097_v9, 4 }
 0xdd8   : > { %v4072_v4 = vsel %vm3864_vm6, %v4070_v41, %v4069_v62  ;;  %v4071_v12 = vsel %vm3864_vm6, %v4069_v62, %v4070_v41 }
 0xdd9   : > { %v4100_v2 = vrot.slane %v4098_v42, 4  ;;  %v4073_v14 = vmul.f32 %v4072_v4, %v6139_v15  ;;  %v4074_v16 = vmul.f32 %v4071_v12, %v6167_v39  ;;  %v4502_v15 = vld [vmem:[%s6363_s10] ss:$0 sm:$0xff] }
 0xddb   : > { %v4101_v23 = vsel %vm3864_vm6, %v4099_v3, %v4100_v2  ;;  %v4102_v21 = vsel %vm3864_vm6, %v4100_v2, %v4099_v3  ;;  %v4075_v27 = vadd.f32 %v4073_v14, %v4045_v10  ;;  %v4076_v29 = vadd.f32 %v4074_v16, %v4046_v0 }
 0xddc   : > { %v4103_v28 = vmul.f32 %v4101_v23, %v6187_v63  ;;  %v4104_v30 = vmul.f32 %v4102_v21, %v6194_v38 }
 0xdde   : > { %v4105_v61 = vadd.f32 %v4103_v28, %v4075_v27  ;;  %v4106_v1 = vadd.f32 %v4104_v30, %v4076_v29 }
 0xde0   : > { %4880 = vmatprep.mubr.msk.f32.mxu1 %vm4122_vm7, %v4105_v61 }
 0xde1   : > { %4881 = vmatmul.mubr.msk.f32.vlgmr.msra.gmra.mrb[24].mxu1 %vm4122_vm7, %v4106_v1 }
 0xeb4   : > { %v4882_v39 = vpop.f32.mrb[24].mxu1 }
 0xeb5   : > { %v4201_v32 = vadd.f32 %v4882_v39, %v4502_v15  ;;  %v4195_v13 = vpop.f32.mrb[25].mxu1 }
 0xeb6   : > { %v4196_v20 = vadd.f32 %v4502_v15, %v4195_v13 }
 0xeb7   : > { %v4205_v5 = vadd.f32 %v4201_v32, %v6135_v11 }
 0xeb8   : > { %v4204_v63 = vadd.f32 %v4196_v20, %v6142_v18 }
 0xeb9   : > { %v4209_v33 = vsel %vm945_vm0, %v4205_v5, 0.0  ;;  %v4215_v38 = vmul.f32 %v4205_v5, %v4205_v5 }
 0xeba   : > { %4210 = vadd.xlane.f32.xlu0 %v4209_v33  ;;  %v4206_v17 = vsel %vm945_vm0, %v4204_v63, 0.0  ;;  %v4214_v34 = vmul.f32 %v4204_v63, %v4204_v63 }
 0xebb   : > { %4207 = vadd.xlane.f32.xlu1 %v4206_v17  ;;  %v4219_v36 = vsel %vm945_vm0, %v4215_v38, 0.0 }
 0xebc   : > { %v4216_v25 = vsel %vm945_vm0, %v4214_v34, 0.0 }
 0xebe   : > { %4220 = vadd.xlane.f32.xlu0 %v4219_v36 }
 0xebf   : > { %4217 = vadd.xlane.f32.xlu1 %v4216_v25 }
 0xf47   : > { %v4211_v60 = vpop.xlane.xlu0 %4210 }
 0xf48   : > { %v4213_v48 = vmul.f32 0.03125, %v4211_v60  ;;  %v4208_v22 = vpop.xlane.xlu1 %4207 }
 0xf49   : > { %v4212_v11 = vmul.f32 0.03125, %v4208_v22 }
 0xf4a   : > { %v4225_v18 = vmul.f32 %v4213_v48, %v4213_v48  ;;  %v4229_v45 = vsub.f32 %v4205_v5, %v4213_v48 }
 0xf4b   : > { %v4221_v24 = vpop.xlane.xlu0 %4220  ;;  %v4224_v35 = vmul.f32 %v4212_v11, %v4212_v11  ;;  %v4228_v49 = vsub.f32 %v4204_v63, %v4212_v11 }
 0xf4c   : > { %v4223_v37 = vmul.f32 0.03125, %v4221_v24  ;;  %v4218_v40 = vpop.xlane.xlu1 %4217 }
 0xf4d   : > { %v4222_v43 = vmul.f32 0.03125, %v4218_v40 }
 0xf4e   : > { %v4227_v31 = vsub.f32 %v4223_v37, %v4225_v18 }
 0xf4f   : > { %v4226_v44 = vsub.f32 %v4222_v43, %v4224_v35 }
 0xf50   : > { %v4231_v6 = vadd.f32 1e-05, %v4227_v31 }
 0xf51   : > { %v4230_v8 = vadd.f32 1e-05, %v4226_v44 }
 0xf52   : > { %5266 = vrsqrt.f32 %v4231_v6 }
 0xf53   : > { %5268 = vrsqrt.f32 %v4230_v8 }
 0xf5c   : > { %v5267_v7 = vpop.eup %5266 }
 0xf5d   : > { %v5269_v50 = vpop.eup %5268  ;;  %v4235_v52 = vmul.f32 %v5267_v7, %v4229_v45 }
 0xf5e   : > { %v4234_v53 = vmul.f32 %v5269_v50, %v4228_v49 }
 0xf5f   : > { %v4241_v54 = vmul.f32 %v4239_v47, %v4235_v52 }
 0xf60   : > { %v4240_v10 = vmul.f32 %v4239_v47, %v4234_v53 }
 0xf61   : > { %v4247_v55 = vadd.f32 %v4245_v51, %v4241_v54 }
 0xf62   : > { %v4246_v56 = vadd.f32 %v4245_v51, %v4240_v10 }
 0xf63   : > { %4249 = vst.msk [vmem:[%s922_s29 + $0x8] sm:$0xff] %vm945_vm0, %v4247_v55 }
 0xf64   : > { %4248 = vst.msk [vmem:[%s922_s29] sm:$0xff] %vm945_vm0, %v4246_v56 }
 0xf65 PF: > { %s6365_s26 = sld [smem:[#allocation13_spill]] }
 0xf6b   : > { %s39_s27 = sadd.s32 1, %s6365_s26  }
 0xf6c   : > { %p36_p6 = scmp.ge.s32.totalorder %s39_s27, 4  }
 0xf6e   :  { %38 = sbr.rel (!%p36_p6) target bundleno = 19 (0x13), region = 184 }
 0xf75   :  { %4271 = vsyncpa [#allocation3], 1 }
 0xf76   :  { %4273 = vsyncpa [#allocation3 + $0x1], 1 }
 0xf77   :  { %4274 = vsyncpa [#allocation5], 1 }
 0xf78   :  { %4275 = vsyncpa [#allocation8], 1 }

</bundles_post_ra>
